<compile_context>
chip_gen: v7x
topology: tpu7x:2x2x1
jax: 0.10.0
libtpu: 0.0.40
codegen_flags: <defaults>
</compile_context>

<pallas_src>
from functools import partial

import jax
import jax.numpy as jnp
from jax.experimental import pallas as pl
from jax.experimental.pallas import tpu as pltpu


def fused_gat_kernel(h_ref, mask_ref, w1_ref, b1_ref, w2_ref, b2_ref, w3_ref, b3m_ref,
                     out_ref, act_ref, *, num_heads, hidden_dim, out_dim):
    H = num_heads

    # Additive adjacency bias (0 where edge j->i exists, ~-1e30 otherwise).
    # Precomputed in the wrapper (bf16 DMA), upcast ONCE, reused by every layer/head.
    mask_bias = mask_ref[...].astype(jnp.float32)            # (N, N)

    def gat_heads(x, w_ref, F):
        """One GATConv layer: returns per-head aggregations [(N, F) f32], bias not added."""
        HF = H * F
        # Single lane-dense MXU call gives z and both attention projections.
        # bf16 inputs, f32 accumulation.
        zaug = jnp.dot(x.astype(jnp.bfloat16), w_ref[...],
                       preferred_element_type=jnp.float32)    # (N, HF + 2H)
        z_b = zaug[:, :HF].astype(jnp.bfloat16)               # aggregation RHS, cast once
        el_t = zaug[:, HF:HF + H].T                           # (H, N) source-side scores

        outs = []
        for h in range(H):                                    # static unroll, head-major
            er_col = zaug[:, HF + H + h:HF + H + h + 1]       # (N, 1) dst-side scores
            # Mask folded into the same broadcast add; LeakyReLU(0.2) via maximum.
            # Masked logits stay ~-2e29, so exp underflows to exactly 0.
            s = er_col + el_t[h:h + 1, :] + mask_bias         # (N, N)
            e = jnp.maximum(s, 0.2 * s)                       # LeakyReLU(0.2)
            m = jnp.max(e, axis=-1, keepdims=True)
            p = jnp.exp(e - m)                                # unnormalized attention
            inv = pl.reciprocal(jnp.sum(p, axis=-1, keepdims=True), approx=False)
            # Per-head (N,N)@(N,F): exactly the required MACs (no block-diag blow-up).
            agg = jnp.dot(p.astype(jnp.bfloat16), z_b[:, h * F:(h + 1) * F],
                          preferred_element_type=jnp.float32)  # (N, F)
            outs.append(agg * inv)                            # normalize off the hot region
        return outs

    def assemble(outs, F, b_ref):
        # flatten(1): concatenate heads along lanes via VMEM scratch slice-stores.
        for h in range(H):
            act_ref[:, h * F:(h + 1) * F] = outs[h]
        return act_ref[...] + b_ref[...]                      # (N, H*F)

    h1 = assemble(gat_heads(h_ref[...], w1_ref, hidden_dim), hidden_dim, b1_ref)
    h2 = assemble(gat_heads(h1, w2_ref, hidden_dim), hidden_dim, b2_ref)

    outs3 = gat_heads(h2, w3_ref, out_dim)
    acc = outs3[0]
    for t in outs3[1:]:
        acc = acc + t
    # .mean(1) over heads (head-mean of conv3's bias folded into b3m in the wrapper).
    out_ref[...] = acc * (1.0 / H) + b3m_ref[...]


def _build_w_aug(W, attn_l, attn_r, num_heads, out_feats):
    """[W | W@Al | W@Ar] so z, el, er come from a single matmul (plain-JAX glue; bf16)."""
    f_in = W.shape[0]
    Wh = W.reshape(f_in, num_heads, out_feats)
    Wl = jnp.einsum("ihf,hf->ih", Wh, attn_l)                 # (F_in, H)
    Wr = jnp.einsum("ihf,hf->ih", Wh, attn_r)                 # (F_in, H)
    return jnp.concatenate([W, Wl, Wr], axis=1).astype(jnp.bfloat16)


def gat_model_forward(adj, h, params, *, num_heads, hidden_dim, out_dim):
    """GATModel.forward: conv1.flatten(1) -> conv2.flatten(1) -> conv3.mean(1)."""
    N = h.shape[0]

    W1, al1, ar1, b1 = params["conv1"]
    W2, al2, ar2, b2 = params["conv2"]
    W3, al3, ar3, b3 = params["conv3"]

    w1a = _build_w_aug(W1, al1, ar1, num_heads, hidden_dim)
    w2a = _build_w_aug(W2, al2, ar2, num_heads, hidden_dim)
    w3a = _build_w_aug(W3, al3, ar3, num_heads, out_dim)

    # Additive adjacency mask, precomputed once (adj only feeds a >0 test -> bf16).
    mask_bias = jnp.where(adj > 0, 0.0, -1e30).astype(jnp.bfloat16)
    # Head-mean of conv3's bias (the .mean(1) of a constant), folded in the wrapper.
    b3_mean = b3.reshape(num_heads, out_dim).mean(axis=0).reshape(1, out_dim)

    kern = partial(fused_gat_kernel, num_heads=num_heads,
                   hidden_dim=hidden_dim, out_dim=out_dim)
    vmem = pl.BlockSpec(memory_space=pltpu.MemorySpace.VMEM)
    return pl.pallas_call(
        kern,
        out_shape=jax.ShapeDtypeStruct((N, out_dim), jnp.float32),
        in_specs=[vmem] * 8,
        out_specs=vmem,
        scratch_shapes=[pltpu.VMEM((N, num_heads * hidden_dim), jnp.float32)],
    )(h.astype(jnp.float32), mask_bias,
      w1a, b1.reshape(1, -1).astype(jnp.float32),
      w2a, b2.reshape(1, -1).astype(jnp.float32),
      w3a, b3_mean.astype(jnp.float32))


# ---------------------------- pure-JAX reference ----------------------------

def _gat_layer_ref(h, W, attn_l, attn_r, bias, adj, num_heads, out_feats):
    N = h.shape[0]
    z = h @ W
    z3 = z.reshape(N, num_heads, out_feats)
    el = jnp.einsum("nhf,hf->nh", z3, attn_l)
    er = jnp.einsum("nhf,hf->nh", z3, attn_r)
    e = er[:, None, :] + el[None, :, :]                    # e[i, j, h]
    e = jnp.where(e > 0, e, 0.2 * e)
    e = jnp.where((adj > 0)[:, :, None], e, -jnp.inf)
    alpha = jax.nn.softmax(e, axis=1)                      # over source j
    out = jnp.einsum("ijh,jhf->ihf", alpha, z3)
    return out.reshape(N, num_heads * out_feats) + bias


def gat_model_ref(adj, h, params, *, num_heads, hidden_dim, out_dim):
    N = h.shape[0]
    h = _gat_layer_ref(h, *params["conv1"], adj, num_heads, hidden_dim)
    h = _gat_layer_ref(h, *params["conv2"], adj, num_heads, hidden_dim)
    h = _gat_layer_ref(h, *params["conv3"], adj, num_heads, out_dim)
    return h.reshape(N, num_heads, out_dim).mean(axis=1)


def init_gat_params(key, in_feats, out_feats, num_heads, scale=0.1):
    kw, kl, kr = jax.random.split(key, 3)
    W = scale * jax.random.normal(kw, (in_feats, num_heads * out_feats), jnp.float32)
    attn_l = scale * jax.random.normal(kl, (num_heads, out_feats), jnp.float32)
    attn_r = scale * jax.random.normal(kr, (num_heads, out_feats), jnp.float32)
    bias = jnp.zeros((num_heads * out_feats,), jnp.float32)
    return (W, attn_l, attn_r, bias)


if __name__ == "__main__":
    key = jax.random.PRNGKey(0)

    N = 16           # nodes
    in_dim = 16
    hidden_dim = 8
    out_dim = 8
    num_heads = 4

    k_feat, k_adj, k1, k2, k3 = jax.random.split(key, 5)

    # Node features
    h0 = jax.random.normal(k_feat, (N, in_dim), jnp.float32)

    # Dense random graph (adj[dst, src]) with self-loops so every node has at
    # least one incoming edge (keeps the edge softmax well defined).
    adj = jax.random.bernoulli(k_adj, 0.3, (N, N)).astype(jnp.float32)
    adj = jnp.maximum(adj, jnp.eye(N, dtype=jnp.float32))

    params = {
        "conv1": init_gat_params(k1, in_dim, hidden_dim, num_heads),
        "conv2": init_gat_params(k2, hidden_dim * num_heads, hidden_dim, num_heads),
        "conv3": init_gat_params(k3, hidden_dim * num_heads, out_dim, num_heads),
    }

    out = gat_model_forward(adj, h0, params, num_heads=num_heads,
                            hidden_dim=hidden_dim, out_dim=out_dim)
    out = jax.block_until_ready(out)

    ref = gat_model_ref(adj, h0, params, num_heads=num_heads,
                        hidden_dim=hidden_dim, out_dim=out_dim)

    assert out.shape == (N, out_dim), out.shape
    assert bool(jnp.all(jnp.isfinite(out)))
    # bf16 MXU inputs (f32 accumulation / f32 softmax) -> generous but meaningful tolerance
    assert bool(jnp.allclose(out, ref, rtol=2e-2, atol=2e-2)), \
        float(jnp.max(jnp.abs(out - ref)))
    print("KERNEL_OK")
</pallas_src>

<mosaic_0001>
module attributes {stable_mosaic.version = 11 : i64} {
  func.func @fused_gat_kernel(%arg0: memref<16x16xf32, #tpu.memory_space<vmem>>, %arg1: memref<16x16xbf16, #tpu.memory_space<vmem>>, %arg2: memref<16x40xbf16, #tpu.memory_space<vmem>>, %arg3: memref<1x32xf32, #tpu.memory_space<vmem>>, %arg4: memref<32x40xbf16, #tpu.memory_space<vmem>>, %arg5: memref<1x32xf32, #tpu.memory_space<vmem>>, %arg6: memref<32x40xbf16, #tpu.memory_space<vmem>>, %arg7: memref<1x8xf32, #tpu.memory_space<vmem>>, %arg8: memref<16x8xf32, #tpu.memory_space<vmem>>, %arg9: memref<16x32xf32, #tpu.memory_space<vmem>>) attributes {dimension_semantics = [], scalar_prefetch = 0 : i64, scratch_operands = 1 : i64, tpu.core_type = #tpu.core_type<tc>} {
    %c0 = arith.constant 0 : index
    %c0_0 = arith.constant 0 : index
    %0 = vector.load %arg1[%c0, %c0_0] : memref<16x16xbf16, #tpu.memory_space<vmem>>, vector<16x16xbf16>
    %1 = arith.extf %0 : vector<16x16xbf16> to vector<16x16xf32>
    %c0_1 = arith.constant 0 : index
    %c0_2 = arith.constant 0 : index
    %2 = vector.load %arg0[%c0_1, %c0_2] : memref<16x16xf32, #tpu.memory_space<vmem>>, vector<16x16xf32>
    %3 = arith.truncf %2 : vector<16x16xf32> to vector<16x16xbf16>
    %c0_3 = arith.constant 0 : index
    %c0_4 = arith.constant 0 : index
    %4 = vector.load %arg2[%c0_3, %c0_4] : memref<16x40xbf16, #tpu.memory_space<vmem>>, vector<16x40xbf16>
    %cst = arith.constant dense<0.000000e+00> : vector<16x40xf32>
    %5 = tpu.matmul %3, %4, %cst {dimension_numbers = #tpu.dot_dimension_numbers<[1], [0], [0], [1], [0, 0, 1, 1], [], []>} : vector<16x16xbf16>, vector<16x40xbf16>, vector<16x40xf32> -> vector<16x40xf32>
    %6 = vector.extract_strided_slice %5 {offsets = [0, 0], sizes = [16, 32], strides = [1, 1]} : vector<16x40xf32> to vector<16x32xf32>
    %7 = arith.truncf %6 : vector<16x32xf32> to vector<16x32xbf16>
    %8 = vector.extract_strided_slice %5 {offsets = [0, 32], sizes = [16, 4], strides = [1, 1]} : vector<16x40xf32> to vector<16x4xf32>
    %9 = tpu.transpose %8, [1, 0] : vector<16x4xf32> -> vector<4x16xf32>
    %10 = vector.extract_strided_slice %5 {offsets = [0, 36], sizes = [16, 1], strides = [1, 1]} : vector<16x40xf32> to vector<16x1xf32>
    %11 = vector.extract_strided_slice %9 {offsets = [0, 0], sizes = [1, 16], strides = [1, 1]} : vector<4x16xf32> to vector<1x16xf32>
    %12 = vector.broadcast %10 : vector<16x1xf32> to vector<16x16xf32>
    %13 = vector.broadcast %11 : vector<1x16xf32> to vector<16x16xf32>
    %14 = arith.addf %12, %13 : vector<16x16xf32>
    %15 = arith.addf %14, %1 : vector<16x16xf32>
    %cst_5 = arith.constant 2.000000e-01 : f32
    %16 = vector.broadcast %cst_5 : f32 to vector<16x16xf32>
    %17 = arith.mulf %16, %15 : vector<16x16xf32>
    %18 = arith.maximumf %15, %17 : vector<16x16xf32>
    %cst_6 = arith.constant dense<0xFF800000> : vector<16xf32>
    %19 = vector.multi_reduction <maximumf>, %18, %cst_6 [1] : vector<16x16xf32> to vector<16xf32>
    %20 = vector.shape_cast %19 : vector<16xf32> to vector<16x1xf32>
    %21 = vector.broadcast %20 : vector<16x1xf32> to vector<16x16xf32>
    %22 = arith.subf %18, %21 : vector<16x16xf32>
    %23 = math.exp %22 : vector<16x16xf32>
    %cst_7 = arith.constant dense<0.000000e+00> : vector<16xf32>
    %24 = vector.multi_reduction <add>, %23, %cst_7 [1] : vector<16x16xf32> to vector<16xf32>
    %25 = vector.shape_cast %24 : vector<16xf32> to vector<16x1xf32>
    %26 = tpu.reciprocal %25 : vector<16x1xf32> -> vector<16x1xf32>
    %27 = arith.truncf %23 : vector<16x16xf32> to vector<16x16xbf16>
    %28 = vector.extract_strided_slice %7 {offsets = [0, 0], sizes = [16, 8], strides = [1, 1]} : vector<16x32xbf16> to vector<16x8xbf16>
    %cst_8 = arith.constant dense<0.000000e+00> : vector<16x8xf32>
    %29 = tpu.matmul %27, %28, %cst_8 {dimension_numbers = #tpu.dot_dimension_numbers<[1], [0], [0], [1], [0, 0, 1, 1], [], []>} : vector<16x16xbf16>, vector<16x8xbf16>, vector<16x8xf32> -> vector<16x8xf32>
    %30 = vector.broadcast %26 : vector<16x1xf32> to vector<16x8xf32>
    %31 = arith.mulf %29, %30 : vector<16x8xf32>
    %32 = vector.extract_strided_slice %5 {offsets = [0, 37], sizes = [16, 1], strides = [1, 1]} : vector<16x40xf32> to vector<16x1xf32>
    %33 = vector.extract_strided_slice %9 {offsets = [1, 0], sizes = [1, 16], strides = [1, 1]} : vector<4x16xf32> to vector<1x16xf32>
    %34 = vector.broadcast %32 : vector<16x1xf32> to vector<16x16xf32>
    %35 = vector.broadcast %33 : vector<1x16xf32> to vector<16x16xf32>
    %36 = arith.addf %34, %35 : vector<16x16xf32>
    %37 = arith.addf %36, %1 : vector<16x16xf32>
    %cst_9 = arith.constant 2.000000e-01 : f32
    %38 = vector.broadcast %cst_9 : f32 to vector<16x16xf32>
    %39 = arith.mulf %38, %37 : vector<16x16xf32>
    %40 = arith.maximumf %37, %39 : vector<16x16xf32>
    %cst_10 = arith.constant dense<0xFF800000> : vector<16xf32>
    %41 = vector.multi_reduction <maximumf>, %40, %cst_10 [1] : vector<16x16xf32> to vector<16xf32>
    %42 = vector.shape_cast %41 : vector<16xf32> to vector<16x1xf32>
    %43 = vector.broadcast %42 : vector<16x1xf32> to vector<16x16xf32>
    %44 = arith.subf %40, %43 : vector<16x16xf32>
    %45 = math.exp %44 : vector<16x16xf32>
    %cst_11 = arith.constant dense<0.000000e+00> : vector<16xf32>
    %46 = vector.multi_reduction <add>, %45, %cst_11 [1] : vector<16x16xf32> to vector<16xf32>
    %47 = vector.shape_cast %46 : vector<16xf32> to vector<16x1xf32>
    %48 = tpu.reciprocal %47 : vector<16x1xf32> -> vector<16x1xf32>
    %49 = arith.truncf %45 : vector<16x16xf32> to vector<16x16xbf16>
    %50 = vector.extract_strided_slice %7 {offsets = [0, 8], sizes = [16, 8], strides = [1, 1]} : vector<16x32xbf16> to vector<16x8xbf16>
    %cst_12 = arith.constant dense<0.000000e+00> : vector<16x8xf32>
    %51 = tpu.matmul %49, %50, %cst_12 {dimension_numbers = #tpu.dot_dimension_numbers<[1], [0], [0], [1], [0, 0, 1, 1], [], []>} : vector<16x16xbf16>, vector<16x8xbf16>, vector<16x8xf32> -> vector<16x8xf32>
    %52 = vector.broadcast %48 : vector<16x1xf32> to vector<16x8xf32>
    %53 = arith.mulf %51, %52 : vector<16x8xf32>
    %54 = vector.extract_strided_slice %5 {offsets = [0, 38], sizes = [16, 1], strides = [1, 1]} : vector<16x40xf32> to vector<16x1xf32>
    %55 = vector.extract_strided_slice %9 {offsets = [2, 0], sizes = [1, 16], strides = [1, 1]} : vector<4x16xf32> to vector<1x16xf32>
    %56 = vector.broadcast %54 : vector<16x1xf32> to vector<16x16xf32>
    %57 = vector.broadcast %55 : vector<1x16xf32> to vector<16x16xf32>
    %58 = arith.addf %56, %57 : vector<16x16xf32>
    %59 = arith.addf %58, %1 : vector<16x16xf32>
    %cst_13 = arith.constant 2.000000e-01 : f32
    %60 = vector.broadcast %cst_13 : f32 to vector<16x16xf32>
    %61 = arith.mulf %60, %59 : vector<16x16xf32>
    %62 = arith.maximumf %59, %61 : vector<16x16xf32>
    %cst_14 = arith.constant dense<0xFF800000> : vector<16xf32>
    %63 = vector.multi_reduction <maximumf>, %62, %cst_14 [1] : vector<16x16xf32> to vector<16xf32>
    %64 = vector.shape_cast %63 : vector<16xf32> to vector<16x1xf32>
    %65 = vector.broadcast %64 : vector<16x1xf32> to vector<16x16xf32>
    %66 = arith.subf %62, %65 : vector<16x16xf32>
    %67 = math.exp %66 : vector<16x16xf32>
    %cst_15 = arith.constant dense<0.000000e+00> : vector<16xf32>
    %68 = vector.multi_reduction <add>, %67, %cst_15 [1] : vector<16x16xf32> to vector<16xf32>
    %69 = vector.shape_cast %68 : vector<16xf32> to vector<16x1xf32>
    %70 = tpu.reciprocal %69 : vector<16x1xf32> -> vector<16x1xf32>
    %71 = arith.truncf %67 : vector<16x16xf32> to vector<16x16xbf16>
    %72 = vector.extract_strided_slice %7 {offsets = [0, 16], sizes = [16, 8], strides = [1, 1]} : vector<16x32xbf16> to vector<16x8xbf16>
    %cst_16 = arith.constant dense<0.000000e+00> : vector<16x8xf32>
    %73 = tpu.matmul %71, %72, %cst_16 {dimension_numbers = #tpu.dot_dimension_numbers<[1], [0], [0], [1], [0, 0, 1, 1], [], []>} : vector<16x16xbf16>, vector<16x8xbf16>, vector<16x8xf32> -> vector<16x8xf32>
    %74 = vector.broadcast %70 : vector<16x1xf32> to vector<16x8xf32>
    %75 = arith.mulf %73, %74 : vector<16x8xf32>
    %76 = vector.extract_strided_slice %5 {offsets = [0, 39], sizes = [16, 1], strides = [1, 1]} : vector<16x40xf32> to vector<16x1xf32>
    %77 = vector.extract_strided_slice %9 {offsets = [3, 0], sizes = [1, 16], strides = [1, 1]} : vector<4x16xf32> to vector<1x16xf32>
    %78 = vector.broadcast %76 : vector<16x1xf32> to vector<16x16xf32>
    %79 = vector.broadcast %77 : vector<1x16xf32> to vector<16x16xf32>
    %80 = arith.addf %78, %79 : vector<16x16xf32>
    %81 = arith.addf %80, %1 : vector<16x16xf32>
    %cst_17 = arith.constant 2.000000e-01 : f32
    %82 = vector.broadcast %cst_17 : f32 to vector<16x16xf32>
    %83 = arith.mulf %82, %81 : vector<16x16xf32>
    %84 = arith.maximumf %81, %83 : vector<16x16xf32>
    %cst_18 = arith.constant dense<0xFF800000> : vector<16xf32>
    %85 = vector.multi_reduction <maximumf>, %84, %cst_18 [1] : vector<16x16xf32> to vector<16xf32>
    %86 = vector.shape_cast %85 : vector<16xf32> to vector<16x1xf32>
    %87 = vector.broadcast %86 : vector<16x1xf32> to vector<16x16xf32>
    %88 = arith.subf %84, %87 : vector<16x16xf32>
    %89 = math.exp %88 : vector<16x16xf32>
    %cst_19 = arith.constant dense<0.000000e+00> : vector<16xf32>
    %90 = vector.multi_reduction <add>, %89, %cst_19 [1] : vector<16x16xf32> to vector<16xf32>
    %91 = vector.shape_cast %90 : vector<16xf32> to vector<16x1xf32>
    %92 = tpu.reciprocal %91 : vector<16x1xf32> -> vector<16x1xf32>
    %93 = arith.truncf %89 : vector<16x16xf32> to vector<16x16xbf16>
    %94 = vector.extract_strided_slice %7 {offsets = [0, 24], sizes = [16, 8], strides = [1, 1]} : vector<16x32xbf16> to vector<16x8xbf16>
    %cst_20 = arith.constant dense<0.000000e+00> : vector<16x8xf32>
    %95 = tpu.matmul %93, %94, %cst_20 {dimension_numbers = #tpu.dot_dimension_numbers<[1], [0], [0], [1], [0, 0, 1, 1], [], []>} : vector<16x16xbf16>, vector<16x8xbf16>, vector<16x8xf32> -> vector<16x8xf32>
    %96 = vector.broadcast %92 : vector<16x1xf32> to vector<16x8xf32>
    %97 = arith.mulf %95, %96 : vector<16x8xf32>
    %c0_21 = arith.constant 0 : index
    %c0_22 = arith.constant 0 : index
    %98 = vector.load %arg9[%c0_21, %c0_22] : memref<16x32xf32, #tpu.memory_space<vmem>>, vector<16x8xf32>
    tpu.vector_store %arg9[%c0_21, %c0_22], %31 {strides = array<i32>} : memref<16x32xf32, #tpu.memory_space<vmem>>, vector<16x8xf32>,
    %c0_23 = arith.constant 0 : index
    %c8 = arith.constant 8 : index
    %99 = vector.load %arg9[%c0_23, %c8] : memref<16x32xf32, #tpu.memory_space<vmem>>, vector<16x8xf32>
    tpu.vector_store %arg9[%c0_23, %c8], %53 {strides = array<i32>} : memref<16x32xf32, #tpu.memory_space<vmem>>, vector<16x8xf32>,
    %c0_24 = arith.constant 0 : index
    %c16 = arith.constant 16 : index
    %100 = vector.load %arg9[%c0_24, %c16] : memref<16x32xf32, #tpu.memory_space<vmem>>, vector<16x8xf32>
    tpu.vector_store %arg9[%c0_24, %c16], %75 {strides = array<i32>} : memref<16x32xf32, #tpu.memory_space<vmem>>, vector<16x8xf32>,
    %c0_25 = arith.constant 0 : index
    %c24 = arith.constant 24 : index
    %101 = vector.load %arg9[%c0_25, %c24] : memref<16x32xf32, #tpu.memory_space<vmem>>, vector<16x8xf32>
    tpu.vector_store %arg9[%c0_25, %c24], %97 {strides = array<i32>} : memref<16x32xf32, #tpu.memory_space<vmem>>, vector<16x8xf32>,
    %c0_26 = arith.constant 0 : index
    %c0_27 = arith.constant 0 : index
    %102 = vector.load %arg9[%c0_26, %c0_27] : memref<16x32xf32, #tpu.memory_space<vmem>>, vector<16x32xf32>
    %c0_28 = arith.constant 0 : index
    %c0_29 = arith.constant 0 : index
    %103 = vector.load %arg3[%c0_28, %c0_29] : memref<1x32xf32, #tpu.memory_space<vmem>>, vector<1x32xf32>
    %104 = vector.broadcast %103 : vector<1x32xf32> to vector<16x32xf32>
    %105 = arith.addf %102, %104 : vector<16x32xf32>
    %106 = arith.truncf %105 : vector<16x32xf32> to vector<16x32xbf16>
    %c0_30 = arith.constant 0 : index
    %c0_31 = arith.constant 0 : index
    %107 = vector.load %arg4[%c0_30, %c0_31] : memref<32x40xbf16, #tpu.memory_space<vmem>>, vector<32x40xbf16>
    %cst_32 = arith.constant dense<0.000000e+00> : vector<16x40xf32>
    %108 = tpu.matmul %106, %107, %cst_32 {dimension_numbers = #tpu.dot_dimension_numbers<[1], [0], [0], [1], [0, 0, 1, 1], [], []>} : vector<16x32xbf16>, vector<32x40xbf16>, vector<16x40xf32> -> vector<16x40xf32>
    %109 = vector.extract_strided_slice %108 {offsets = [0, 0], sizes = [16, 32], strides = [1, 1]} : vector<16x40xf32> to vector<16x32xf32>
    %110 = arith.truncf %109 : vector<16x32xf32> to vector<16x32xbf16>
    %111 = vector.extract_strided_slice %108 {offsets = [0, 32], sizes = [16, 4], strides = [1, 1]} : vector<16x40xf32> to vector<16x4xf32>
    %112 = tpu.transpose %111, [1, 0] : vector<16x4xf32> -> vector<4x16xf32>
    %113 = vector.extract_strided_slice %108 {offsets = [0, 36], sizes = [16, 1], strides = [1, 1]} : vector<16x40xf32> to vector<16x1xf32>
    %114 = vector.extract_strided_slice %112 {offsets = [0, 0], sizes = [1, 16], strides = [1, 1]} : vector<4x16xf32> to vector<1x16xf32>
    %115 = vector.broadcast %113 : vector<16x1xf32> to vector<16x16xf32>
    %116 = vector.broadcast %114 : vector<1x16xf32> to vector<16x16xf32>
    %117 = arith.addf %115, %116 : vector<16x16xf32>
    %118 = arith.addf %117, %1 : vector<16x16xf32>
    %cst_33 = arith.constant 2.000000e-01 : f32
    %119 = vector.broadcast %cst_33 : f32 to vector<16x16xf32>
    %120 = arith.mulf %119, %118 : vector<16x16xf32>
    %121 = arith.maximumf %118, %120 : vector<16x16xf32>
    %cst_34 = arith.constant dense<0xFF800000> : vector<16xf32>
    %122 = vector.multi_reduction <maximumf>, %121, %cst_34 [1] : vector<16x16xf32> to vector<16xf32>
    %123 = vector.shape_cast %122 : vector<16xf32> to vector<16x1xf32>
    %124 = vector.broadcast %123 : vector<16x1xf32> to vector<16x16xf32>
    %125 = arith.subf %121, %124 : vector<16x16xf32>
    %126 = math.exp %125 : vector<16x16xf32>
    %cst_35 = arith.constant dense<0.000000e+00> : vector<16xf32>
    %127 = vector.multi_reduction <add>, %126, %cst_35 [1] : vector<16x16xf32> to vector<16xf32>
    %128 = vector.shape_cast %127 : vector<16xf32> to vector<16x1xf32>
    %129 = tpu.reciprocal %128 : vector<16x1xf32> -> vector<16x1xf32>
    %130 = arith.truncf %126 : vector<16x16xf32> to vector<16x16xbf16>
    %131 = vector.extract_strided_slice %110 {offsets = [0, 0], sizes = [16, 8], strides = [1, 1]} : vector<16x32xbf16> to vector<16x8xbf16>
    %cst_36 = arith.constant dense<0.000000e+00> : vector<16x8xf32>
    %132 = tpu.matmul %130, %131, %cst_36 {dimension_numbers = #tpu.dot_dimension_numbers<[1], [0], [0], [1], [0, 0, 1, 1], [], []>} : vector<16x16xbf16>, vector<16x8xbf16>, vector<16x8xf32> -> vector<16x8xf32>
    %133 = vector.broadcast %129 : vector<16x1xf32> to vector<16x8xf32>
    %134 = arith.mulf %132, %133 : vector<16x8xf32>
    %135 = vector.extract_strided_slice %108 {offsets = [0, 37], sizes = [16, 1], strides = [1, 1]} : vector<16x40xf32> to vector<16x1xf32>
    %136 = vector.extract_strided_slice %112 {offsets = [1, 0], sizes = [1, 16], strides = [1, 1]} : vector<4x16xf32> to vector<1x16xf32>
    %137 = vector.broadcast %135 : vector<16x1xf32> to vector<16x16xf32>
    %138 = vector.broadcast %136 : vector<1x16xf32> to vector<16x16xf32>
    %139 = arith.addf %137, %138 : vector<16x16xf32>
    %140 = arith.addf %139, %1 : vector<16x16xf32>
    %cst_37 = arith.constant 2.000000e-01 : f32
    %141 = vector.broadcast %cst_37 : f32 to vector<16x16xf32>
    %142 = arith.mulf %141, %140 : vector<16x16xf32>
    %143 = arith.maximumf %140, %142 : vector<16x16xf32>
    %cst_38 = arith.constant dense<0xFF800000> : vector<16xf32>
    %144 = vector.multi_reduction <maximumf>, %143, %cst_38 [1] : vector<16x16xf32> to vector<16xf32>
    %145 = vector.shape_cast %144 : vector<16xf32> to vector<16x1xf32>
    %146 = vector.broadcast %145 : vector<16x1xf32> to vector<16x16xf32>
    %147 = arith.subf %143, %146 : vector<16x16xf32>
    %148 = math.exp %147 : vector<16x16xf32>
    %cst_39 = arith.constant dense<0.000000e+00> : vector<16xf32>
    %149 = vector.multi_reduction <add>, %148, %cst_39 [1] : vector<16x16xf32> to vector<16xf32>
    %150 = vector.shape_cast %149 : vector<16xf32> to vector<16x1xf32>
    %151 = tpu.reciprocal %150 : vector<16x1xf32> -> vector<16x1xf32>
    %152 = arith.truncf %148 : vector<16x16xf32> to vector<16x16xbf16>
    %153 = vector.extract_strided_slice %110 {offsets = [0, 8], sizes = [16, 8], strides = [1, 1]} : vector<16x32xbf16> to vector<16x8xbf16>
    %cst_40 = arith.constant dense<0.000000e+00> : vector<16x8xf32>
    %154 = tpu.matmul %152, %153, %cst_40 {dimension_numbers = #tpu.dot_dimension_numbers<[1], [0], [0], [1], [0, 0, 1, 1], [], []>} : vector<16x16xbf16>, vector<16x8xbf16>, vector<16x8xf32> -> vector<16x8xf32>
    %155 = vector.broadcast %151 : vector<16x1xf32> to vector<16x8xf32>
    %156 = arith.mulf %154, %155 : vector<16x8xf32>
    %157 = vector.extract_strided_slice %108 {offsets = [0, 38], sizes = [16, 1], strides = [1, 1]} : vector<16x40xf32> to vector<16x1xf32>
    %158 = vector.extract_strided_slice %112 {offsets = [2, 0], sizes = [1, 16], strides = [1, 1]} : vector<4x16xf32> to vector<1x16xf32>
    %159 = vector.broadcast %157 : vector<16x1xf32> to vector<16x16xf32>
    %160 = vector.broadcast %158 : vector<1x16xf32> to vector<16x16xf32>
    %161 = arith.addf %159, %160 : vector<16x16xf32>
    %162 = arith.addf %161, %1 : vector<16x16xf32>
    %cst_41 = arith.constant 2.000000e-01 : f32
    %163 = vector.broadcast %cst_41 : f32 to vector<16x16xf32>
    %164 = arith.mulf %163, %162 : vector<16x16xf32>
    %165 = arith.maximumf %162, %164 : vector<16x16xf32>
    %cst_42 = arith.constant dense<0xFF800000> : vector<16xf32>
    %166 = vector.multi_reduction <maximumf>, %165, %cst_42 [1] : vector<16x16xf32> to vector<16xf32>
    %167 = vector.shape_cast %166 : vector<16xf32> to vector<16x1xf32>
    %168 = vector.broadcast %167 : vector<16x1xf32> to vector<16x16xf32>
    %169 = arith.subf %165, %168 : vector<16x16xf32>
    %170 = math.exp %169 : vector<16x16xf32>
    %cst_43 = arith.constant dense<0.000000e+00> : vector<16xf32>
    %171 = vector.multi_reduction <add>, %170, %cst_43 [1] : vector<16x16xf32> to vector<16xf32>
    %172 = vector.shape_cast %171 : vector<16xf32> to vector<16x1xf32>
    %173 = tpu.reciprocal %172 : vector<16x1xf32> -> vector<16x1xf32>
    %174 = arith.truncf %170 : vector<16x16xf32> to vector<16x16xbf16>
    %175 = vector.extract_strided_slice %110 {offsets = [0, 16], sizes = [16, 8], strides = [1, 1]} : vector<16x32xbf16> to vector<16x8xbf16>
    %cst_44 = arith.constant dense<0.000000e+00> : vector<16x8xf32>
    %176 = tpu.matmul %174, %175, %cst_44 {dimension_numbers = #tpu.dot_dimension_numbers<[1], [0], [0], [1], [0, 0, 1, 1], [], []>} : vector<16x16xbf16>, vector<16x8xbf16>, vector<16x8xf32> -> vector<16x8xf32>
    %177 = vector.broadcast %173 : vector<16x1xf32> to vector<16x8xf32>
    %178 = arith.mulf %176, %177 : vector<16x8xf32>
    %179 = vector.extract_strided_slice %108 {offsets = [0, 39], sizes = [16, 1], strides = [1, 1]} : vector<16x40xf32> to vector<16x1xf32>
    %180 = vector.extract_strided_slice %112 {offsets = [3, 0], sizes = [1, 16], strides = [1, 1]} : vector<4x16xf32> to vector<1x16xf32>
    %181 = vector.broadcast %179 : vector<16x1xf32> to vector<16x16xf32>
    %182 = vector.broadcast %180 : vector<1x16xf32> to vector<16x16xf32>
    %183 = arith.addf %181, %182 : vector<16x16xf32>
    %184 = arith.addf %183, %1 : vector<16x16xf32>
    %cst_45 = arith.constant 2.000000e-01 : f32
    %185 = vector.broadcast %cst_45 : f32 to vector<16x16xf32>
    %186 = arith.mulf %185, %184 : vector<16x16xf32>
    %187 = arith.maximumf %184, %186 : vector<16x16xf32>
    %cst_46 = arith.constant dense<0xFF800000> : vector<16xf32>
    %188 = vector.multi_reduction <maximumf>, %187, %cst_46 [1] : vector<16x16xf32> to vector<16xf32>
    %189 = vector.shape_cast %188 : vector<16xf32> to vector<16x1xf32>
    %190 = vector.broadcast %189 : vector<16x1xf32> to vector<16x16xf32>
    %191 = arith.subf %187, %190 : vector<16x16xf32>
    %192 = math.exp %191 : vector<16x16xf32>
    %cst_47 = arith.constant dense<0.000000e+00> : vector<16xf32>
    %193 = vector.multi_reduction <add>, %192, %cst_47 [1] : vector<16x16xf32> to vector<16xf32>
    %194 = vector.shape_cast %193 : vector<16xf32> to vector<16x1xf32>
    %195 = tpu.reciprocal %194 : vector<16x1xf32> -> vector<16x1xf32>
    %196 = arith.truncf %192 : vector<16x16xf32> to vector<16x16xbf16>
    %197 = vector.extract_strided_slice %110 {offsets = [0, 24], sizes = [16, 8], strides = [1, 1]} : vector<16x32xbf16> to vector<16x8xbf16>
    %cst_48 = arith.constant dense<0.000000e+00> : vector<16x8xf32>
    %198 = tpu.matmul %196, %197, %cst_48 {dimension_numbers = #tpu.dot_dimension_numbers<[1], [0], [0], [1], [0, 0, 1, 1], [], []>} : vector<16x16xbf16>, vector<16x8xbf16>, vector<16x8xf32> -> vector<16x8xf32>
    %199 = vector.broadcast %195 : vector<16x1xf32> to vector<16x8xf32>
    %200 = arith.mulf %198, %199 : vector<16x8xf32>
    %c0_49 = arith.constant 0 : index
    %c0_50 = arith.constant 0 : index
    %201 = vector.load %arg9[%c0_49, %c0_50] : memref<16x32xf32, #tpu.memory_space<vmem>>, vector<16x8xf32>
    tpu.vector_store %arg9[%c0_49, %c0_50], %134 {strides = array<i32>} : memref<16x32xf32, #tpu.memory_space<vmem>>, vector<16x8xf32>,
    %c0_51 = arith.constant 0 : index
    %c8_52 = arith.constant 8 : index
    %202 = vector.load %arg9[%c0_51, %c8_52] : memref<16x32xf32, #tpu.memory_space<vmem>>, vector<16x8xf32>
    tpu.vector_store %arg9[%c0_51, %c8_52], %156 {strides = array<i32>} : memref<16x32xf32, #tpu.memory_space<vmem>>, vector<16x8xf32>,
    %c0_53 = arith.constant 0 : index
    %c16_54 = arith.constant 16 : index
    %203 = vector.load %arg9[%c0_53, %c16_54] : memref<16x32xf32, #tpu.memory_space<vmem>>, vector<16x8xf32>
    tpu.vector_store %arg9[%c0_53, %c16_54], %178 {strides = array<i32>} : memref<16x32xf32, #tpu.memory_space<vmem>>, vector<16x8xf32>,
    %c0_55 = arith.constant 0 : index
    %c24_56 = arith.constant 24 : index
    %204 = vector.load %arg9[%c0_55, %c24_56] : memref<16x32xf32, #tpu.memory_space<vmem>>, vector<16x8xf32>
    tpu.vector_store %arg9[%c0_55, %c24_56], %200 {strides = array<i32>} : memref<16x32xf32, #tpu.memory_space<vmem>>, vector<16x8xf32>,
    %c0_57 = arith.constant 0 : index
    %c0_58 = arith.constant 0 : index
    %205 = vector.load %arg9[%c0_57, %c0_58] : memref<16x32xf32, #tpu.memory_space<vmem>>, vector<16x32xf32>
    %c0_59 = arith.constant 0 : index
    %c0_60 = arith.constant 0 : index
    %206 = vector.load %arg5[%c0_59, %c0_60] : memref<1x32xf32, #tpu.memory_space<vmem>>, vector<1x32xf32>
    %207 = vector.broadcast %206 : vector<1x32xf32> to vector<16x32xf32>
    %208 = arith.addf %205, %207 : vector<16x32xf32>
    %209 = arith.truncf %208 : vector<16x32xf32> to vector<16x32xbf16>
    %c0_61 = arith.constant 0 : index
    %c0_62 = arith.constant 0 : index
    %210 = vector.load %arg6[%c0_61, %c0_62] : memref<32x40xbf16, #tpu.memory_space<vmem>>, vector<32x40xbf16>
    %cst_63 = arith.constant dense<0.000000e+00> : vector<16x40xf32>
    %211 = tpu.matmul %209, %210, %cst_63 {dimension_numbers = #tpu.dot_dimension_numbers<[1], [0], [0], [1], [0, 0, 1, 1], [], []>} : vector<16x32xbf16>, vector<32x40xbf16>, vector<16x40xf32> -> vector<16x40xf32>
    %212 = vector.extract_strided_slice %211 {offsets = [0, 0], sizes = [16, 32], strides = [1, 1]} : vector<16x40xf32> to vector<16x32xf32>
    %213 = arith.truncf %212 : vector<16x32xf32> to vector<16x32xbf16>
    %214 = vector.extract_strided_slice %211 {offsets = [0, 32], sizes = [16, 4], strides = [1, 1]} : vector<16x40xf32> to vector<16x4xf32>
    %215 = tpu.transpose %214, [1, 0] : vector<16x4xf32> -> vector<4x16xf32>
    %216 = vector.extract_strided_slice %211 {offsets = [0, 36], sizes = [16, 1], strides = [1, 1]} : vector<16x40xf32> to vector<16x1xf32>
    %217 = vector.extract_strided_slice %215 {offsets = [0, 0], sizes = [1, 16], strides = [1, 1]} : vector<4x16xf32> to vector<1x16xf32>
    %218 = vector.broadcast %216 : vector<16x1xf32> to vector<16x16xf32>
    %219 = vector.broadcast %217 : vector<1x16xf32> to vector<16x16xf32>
    %220 = arith.addf %218, %219 : vector<16x16xf32>
    %221 = arith.addf %220, %1 : vector<16x16xf32>
    %cst_64 = arith.constant 2.000000e-01 : f32
    %222 = vector.broadcast %cst_64 : f32 to vector<16x16xf32>
    %223 = arith.mulf %222, %221 : vector<16x16xf32>
    %224 = arith.maximumf %221, %223 : vector<16x16xf32>
    %cst_65 = arith.constant dense<0xFF800000> : vector<16xf32>
    %225 = vector.multi_reduction <maximumf>, %224, %cst_65 [1] : vector<16x16xf32> to vector<16xf32>
    %226 = vector.shape_cast %225 : vector<16xf32> to vector<16x1xf32>
    %227 = vector.broadcast %226 : vector<16x1xf32> to vector<16x16xf32>
    %228 = arith.subf %224, %227 : vector<16x16xf32>
    %229 = math.exp %228 : vector<16x16xf32>
    %cst_66 = arith.constant dense<0.000000e+00> : vector<16xf32>
    %230 = vector.multi_reduction <add>, %229, %cst_66 [1] : vector<16x16xf32> to vector<16xf32>
    %231 = vector.shape_cast %230 : vector<16xf32> to vector<16x1xf32>
    %232 = tpu.reciprocal %231 : vector<16x1xf32> -> vector<16x1xf32>
    %233 = arith.truncf %229 : vector<16x16xf32> to vector<16x16xbf16>
    %234 = vector.extract_strided_slice %213 {offsets = [0, 0], sizes = [16, 8], strides = [1, 1]} : vector<16x32xbf16> to vector<16x8xbf16>
    %cst_67 = arith.constant dense<0.000000e+00> : vector<16x8xf32>
    %235 = tpu.matmul %233, %234, %cst_67 {dimension_numbers = #tpu.dot_dimension_numbers<[1], [0], [0], [1], [0, 0, 1, 1], [], []>} : vector<16x16xbf16>, vector<16x8xbf16>, vector<16x8xf32> -> vector<16x8xf32>
    %236 = vector.broadcast %232 : vector<16x1xf32> to vector<16x8xf32>
    %237 = arith.mulf %235, %236 : vector<16x8xf32>
    %238 = vector.extract_strided_slice %211 {offsets = [0, 37], sizes = [16, 1], strides = [1, 1]} : vector<16x40xf32> to vector<16x1xf32>
    %239 = vector.extract_strided_slice %215 {offsets = [1, 0], sizes = [1, 16], strides = [1, 1]} : vector<4x16xf32> to vector<1x16xf32>
    %240 = vector.broadcast %238 : vector<16x1xf32> to vector<16x16xf32>
    %241 = vector.broadcast %239 : vector<1x16xf32> to vector<16x16xf32>
    %242 = arith.addf %240, %241 : vector<16x16xf32>
    %243 = arith.addf %242, %1 : vector<16x16xf32>
    %cst_68 = arith.constant 2.000000e-01 : f32
    %244 = vector.broadcast %cst_68 : f32 to vector<16x16xf32>
    %245 = arith.mulf %244, %243 : vector<16x16xf32>
    %246 = arith.maximumf %243, %245 : vector<16x16xf32>
    %cst_69 = arith.constant dense<0xFF800000> : vector<16xf32>
    %247 = vector.multi_reduction <maximumf>, %246, %cst_69 [1] : vector<16x16xf32> to vector<16xf32>
    %248 = vector.shape_cast %247 : vector<16xf32> to vector<16x1xf32>
    %249 = vector.broadcast %248 : vector<16x1xf32> to vector<16x16xf32>
    %250 = arith.subf %246, %249 : vector<16x16xf32>
    %251 = math.exp %250 : vector<16x16xf32>
    %cst_70 = arith.constant dense<0.000000e+00> : vector<16xf32>
    %252 = vector.multi_reduction <add>, %251, %cst_70 [1] : vector<16x16xf32> to vector<16xf32>
    %253 = vector.shape_cast %252 : vector<16xf32> to vector<16x1xf32>
    %254 = tpu.reciprocal %253 : vector<16x1xf32> -> vector<16x1xf32>
    %255 = arith.truncf %251 : vector<16x16xf32> to vector<16x16xbf16>
    %256 = vector.extract_strided_slice %213 {offsets = [0, 8], sizes = [16, 8], strides = [1, 1]} : vector<16x32xbf16> to vector<16x8xbf16>
    %cst_71 = arith.constant dense<0.000000e+00> : vector<16x8xf32>
    %257 = tpu.matmul %255, %256, %cst_71 {dimension_numbers = #tpu.dot_dimension_numbers<[1], [0], [0], [1], [0, 0, 1, 1], [], []>} : vector<16x16xbf16>, vector<16x8xbf16>, vector<16x8xf32> -> vector<16x8xf32>
    %258 = vector.broadcast %254 : vector<16x1xf32> to vector<16x8xf32>
    %259 = arith.mulf %257, %258 : vector<16x8xf32>
    %260 = vector.extract_strided_slice %211 {offsets = [0, 38], sizes = [16, 1], strides = [1, 1]} : vector<16x40xf32> to vector<16x1xf32>
    %261 = vector.extract_strided_slice %215 {offsets = [2, 0], sizes = [1, 16], strides = [1, 1]} : vector<4x16xf32> to vector<1x16xf32>
    %262 = vector.broadcast %260 : vector<16x1xf32> to vector<16x16xf32>
    %263 = vector.broadcast %261 : vector<1x16xf32> to vector<16x16xf32>
    %264 = arith.addf %262, %263 : vector<16x16xf32>
    %265 = arith.addf %264, %1 : vector<16x16xf32>
    %cst_72 = arith.constant 2.000000e-01 : f32
    %266 = vector.broadcast %cst_72 : f32 to vector<16x16xf32>
    %267 = arith.mulf %266, %265 : vector<16x16xf32>
    %268 = arith.maximumf %265, %267 : vector<16x16xf32>
    %cst_73 = arith.constant dense<0xFF800000> : vector<16xf32>
    %269 = vector.multi_reduction <maximumf>, %268, %cst_73 [1] : vector<16x16xf32> to vector<16xf32>
    %270 = vector.shape_cast %269 : vector<16xf32> to vector<16x1xf32>
    %271 = vector.broadcast %270 : vector<16x1xf32> to vector<16x16xf32>
    %272 = arith.subf %268, %271 : vector<16x16xf32>
    %273 = math.exp %272 : vector<16x16xf32>
    %cst_74 = arith.constant dense<0.000000e+00> : vector<16xf32>
    %274 = vector.multi_reduction <add>, %273, %cst_74 [1] : vector<16x16xf32> to vector<16xf32>
    %275 = vector.shape_cast %274 : vector<16xf32> to vector<16x1xf32>
    %276 = tpu.reciprocal %275 : vector<16x1xf32> -> vector<16x1xf32>
    %277 = arith.truncf %273 : vector<16x16xf32> to vector<16x16xbf16>
    %278 = vector.extract_strided_slice %213 {offsets = [0, 16], sizes = [16, 8], strides = [1, 1]} : vector<16x32xbf16> to vector<16x8xbf16>
    %cst_75 = arith.constant dense<0.000000e+00> : vector<16x8xf32>
    %279 = tpu.matmul %277, %278, %cst_75 {dimension_numbers = #tpu.dot_dimension_numbers<[1], [0], [0], [1], [0, 0, 1, 1], [], []>} : vector<16x16xbf16>, vector<16x8xbf16>, vector<16x8xf32> -> vector<16x8xf32>
    %280 = vector.broadcast %276 : vector<16x1xf32> to vector<16x8xf32>
    %281 = arith.mulf %279, %280 : vector<16x8xf32>
    %282 = vector.extract_strided_slice %211 {offsets = [0, 39], sizes = [16, 1], strides = [1, 1]} : vector<16x40xf32> to vector<16x1xf32>
    %283 = vector.extract_strided_slice %215 {offsets = [3, 0], sizes = [1, 16], strides = [1, 1]} : vector<4x16xf32> to vector<1x16xf32>
    %284 = vector.broadcast %282 : vector<16x1xf32> to vector<16x16xf32>
    %285 = vector.broadcast %283 : vector<1x16xf32> to vector<16x16xf32>
    %286 = arith.addf %284, %285 : vector<16x16xf32>
    %287 = arith.addf %286, %1 : vector<16x16xf32>
    %cst_76 = arith.constant 2.000000e-01 : f32
    %288 = vector.broadcast %cst_76 : f32 to vector<16x16xf32>
    %289 = arith.mulf %288, %287 : vector<16x16xf32>
    %290 = arith.maximumf %287, %289 : vector<16x16xf32>
    %cst_77 = arith.constant dense<0xFF800000> : vector<16xf32>
    %291 = vector.multi_reduction <maximumf>, %290, %cst_77 [1] : vector<16x16xf32> to vector<16xf32>
    %292 = vector.shape_cast %291 : vector<16xf32> to vector<16x1xf32>
    %293 = vector.broadcast %292 : vector<16x1xf32> to vector<16x16xf32>
    %294 = arith.subf %290, %293 : vector<16x16xf32>
    %295 = math.exp %294 : vector<16x16xf32>
    %cst_78 = arith.constant dense<0.000000e+00> : vector<16xf32>
    %296 = vector.multi_reduction <add>, %295, %cst_78 [1] : vector<16x16xf32> to vector<16xf32>
    %297 = vector.shape_cast %296 : vector<16xf32> to vector<16x1xf32>
    %298 = tpu.reciprocal %297 : vector<16x1xf32> -> vector<16x1xf32>
    %299 = arith.truncf %295 : vector<16x16xf32> to vector<16x16xbf16>
    %300 = vector.extract_strided_slice %213 {offsets = [0, 24], sizes = [16, 8], strides = [1, 1]} : vector<16x32xbf16> to vector<16x8xbf16>
    %cst_79 = arith.constant dense<0.000000e+00> : vector<16x8xf32>
    %301 = tpu.matmul %299, %300, %cst_79 {dimension_numbers = #tpu.dot_dimension_numbers<[1], [0], [0], [1], [0, 0, 1, 1], [], []>} : vector<16x16xbf16>, vector<16x8xbf16>, vector<16x8xf32> -> vector<16x8xf32>
    %302 = vector.broadcast %298 : vector<16x1xf32> to vector<16x8xf32>
    %303 = arith.mulf %301, %302 : vector<16x8xf32>
    %304 = arith.addf %237, %259 : vector<16x8xf32>
    %305 = arith.addf %304, %281 : vector<16x8xf32>
    %306 = arith.addf %305, %303 : vector<16x8xf32>
    %cst_80 = arith.constant 2.500000e-01 : f32
    %307 = vector.broadcast %cst_80 : f32 to vector<16x8xf32>
    %308 = arith.mulf %306, %307 : vector<16x8xf32>
    %c0_81 = arith.constant 0 : index
    %c0_82 = arith.constant 0 : index
    %309 = vector.load %arg7[%c0_81, %c0_82] : memref<1x8xf32, #tpu.memory_space<vmem>>, vector<1x8xf32>
    %310 = vector.broadcast %309 : vector<1x8xf32> to vector<16x8xf32>
    %311 = arith.addf %308, %310 : vector<16x8xf32>
    %c0_83 = arith.constant 0 : index
    %c0_84 = arith.constant 0 : index
    %312 = vector.load %arg8[%c0_83, %c0_84] : memref<16x8xf32, #tpu.memory_space<vmem>>, vector<16x8xf32>
    tpu.vector_store %arg8[%c0_83, %c0_84], %311 {strides = array<i32>} : memref<16x8xf32, #tpu.memory_space<vmem>>, vector<16x8xf32>,
    return
  }
}

</mosaic_0001>

<bundles_post_ra>
// kernel: tpu_custom_call.1
= control target key start
LH: loop header
LB: loop body
LE: loop exit
PB: predicated region body
PF: predicated region fallthrough
CT: control target
= control target key end

     0   :  { %13 = vsyncpa [#allocation4], 0  ;;  %s2373_s0 = inlined_call_operand.hbm [shape: f32[16,16], index: 0, kind: input, shape index: {}]   ;;  %s2374_s1 = inlined_call_operand.hbm [shape: bf16[16,16], index: 1, kind: input, shape index: {}]   ;;  %s2375_s2 = inlined_call_operand.hbm [shape: bf16[16,40], index: 2, kind: input, shape index: {}]   ;;  %s2376_s3 = inlined_call_operand.vmem [shape: f32[1,32], index: 3, kind: input, shape index: {}]   ;;  %s2377_s4 = inlined_call_operand.hbm [shape: bf16[32,40], index: 4, kind: input, shape index: {}]   ;;  %s2378_s5 = inlined_call_operand.vmem [shape: f32[1,32], index: 5, kind: input, shape index: {}]   ;;  %s2379_s6 = inlined_call_operand.vmem [shape: bf16[32,40], index: 6, kind: input, shape index: {}]   ;;  %s2380_s7 = inlined_call_operand.vmem [shape: f32[1,8], index: 7, kind: input, shape index: {}]   ;;  %s2381_s8 = inlined_call_operand.vmem [shape: f32[16,8], index: 8, kind: output, shape index: {}]  }
   0x1   :  { %14 = vsyncpa [#allocation6], 0 }
   0x2   :  { %15 = vsyncpa [#allocation9], 0  ;;  %s1973_s27 = smov [#allocation5]   ;;  %s1879_s9 = scalar_lea.hbm %s2374_s1, 128 }
   0x3   :  { %s33_s28 = sshll.u32 %s1973_s27, 4  ;;  %p1880_p0 = scmp.ne.s32.totalorder %s2374_s1, %s1879_s9  ;;  %s34_s28 = int_to_ptr.vmem [resolvable:$true] %s33_s28 }
   0x4   :  { %p1883_p1 = scmp.lt.u32.totalorder %s1879_s9, %s2374_s1 }
   0x6   :  { %p1885_p2 = pnand %p1883_p1, %p1880_p0 }
   0x8   :  { %1888 = shalt.err (!%p1885_p2)
}
   0x9   :  { %s1889_s14 = scalar_lea.vmem %s34_s28, 128  ;;  %p1894_p4 = scmp.lt.s32.totalorder %s34_s28, %s34_s28 }
   0xa   :  { %p1890_p3 = scmp.ne.s32.totalorder %s34_s28, %s1889_s14  ;;  %p1895_p5 = scmp.lt.s32.totalorder %s1889_s14, %s1889_s14 }
   0xc   :  { %p1896_p6 = por %p1895_p5, %p1894_p4 }
   0xe   :  { %p1897_p7 = pnand %p1896_p6, %p1890_p3 }
  0x10   :  { %1900 = shalt.err (!%p1897_p7)
}
  0x11   :  { %s1974_s15 = smov 64   ;;  %s1975_s16 = smov 4  }
  0x12   :  { %39 = dma.hbm_to_vmem [thread:$0]  %s2374_s1, 128, %s34_s28, [#allocation6], %s1974_s15, %s1974_s15, %s1975_s16  }
  0x13   :  { %s1976_s19 = smov [#allocation3]   ;;  %s1901_s23 = scalar_lea.hbm %s2373_s0, 256 }
  0x14   :  { %s21_s20 = sshll.u32 %s1976_s19, 4  ;;  %p1902_p8 = scmp.ne.s32.totalorder %s2373_s0, %s1901_s23  ;;  %s22_s20 = int_to_ptr.vmem [resolvable:$true] %s21_s20 }
  0x15   :  { %p1905_p9 = scmp.lt.u32.totalorder %s1901_s23, %s2373_s0 }
  0x17   :  { %p1907_p10 = pnand %p1905_p9, %p1902_p8 }
  0x19   :  { %1910 = shalt.err (!%p1907_p10)
}
  0x1a   :  { %s1911_s29 = scalar_lea.vmem %s22_s20, 256  ;;  %p1916_p12 = scmp.lt.s32.totalorder %s22_s20, %s22_s20 }
  0x1b   :  { %p1912_p11 = scmp.ne.s32.totalorder %s22_s20, %s1911_s29  ;;  %p1917_p13 = scmp.lt.s32.totalorder %s1911_s29, %s1911_s29 }
  0x1d   :  { %p1918_p0 = por %p1917_p13, %p1916_p12 }
  0x1f   :  { %p1919_p1 = pnand %p1918_p0, %p1912_p11 }
  0x21   :  { %1922 = shalt.err (!%p1919_p1)
}
  0x22   :  { %s1977_s1 = smov 128   ;;  %s1978_s28 = smov 8  }
  0x23   :  { %27 = dma.hbm_to_vmem [thread:$0]  %s2373_s0, 256, %s22_s20, [#allocation4], %s1977_s1, %s1977_s1, %s1978_s28  }
  0x24   :  { %s1979_s10 = smov [#allocation7]   ;;  %s1980_s12 = smov [#allocation8]  }
  0x25   :  { %s45_s11 = sshll.u32 %s1979_s10, 4  ;;  %s59_s13 = sshll.u32 %s1980_s12, 4  ;;  %s46_s11 = int_to_ptr.vmem [resolvable:$true] %s45_s11  ;;  %s2066_s13 = int_to_ptr.vmem [resolvable:$true] %s59_s13 }
  0x26   :  { %s1923_s18 = scalar_lea.hbm %s2375_s2, 128 }
  0x27   :  { %p1924_p2 = scmp.ne.s32.totalorder %s2375_s2, %s1923_s18  ;;  %p1927_p3 = scmp.lt.u32.totalorder %s1923_s18, %s2375_s2 }
  0x29   :  { %p1929_p4 = pnand %p1927_p3, %p1924_p2 }
  0x2b   :  { %1932 = shalt.err (!%p1929_p4)
}
  0x2c   :  { %s1933_s0 = scalar_lea.vmem %s46_s11, 128  ;;  %p1938_p6 = scmp.lt.s32.totalorder %s46_s11, %s46_s11 }
  0x2d   :  { %p1934_p5 = scmp.ne.s32.totalorder %s46_s11, %s1933_s0  ;;  %p1939_p7 = scmp.lt.s32.totalorder %s1933_s0, %s1933_s0 }
  0x2f   :  { %p1940_p8 = por %p1939_p7, %p1938_p6 }
  0x31   :  { %p1941_p9 = pnand %p1940_p8, %p1934_p5 }
  0x33   :  { %1944 = shalt.err (!%p1941_p9)
}
  0x34   :  { %51 = dma.hbm_to_vmem [thread:$0]  %s2375_s2, 128, %s46_s11, [#allocation6], %s1974_s15, %s1974_s15, %s1975_s16  }
  0x35   :  { %s1945_s27 = scalar_lea.hbm %s2377_s4, 256 }
  0x36   :  { %p1946_p10 = scmp.ne.s32.totalorder %s2377_s4, %s1945_s27  ;;  %p1949_p11 = scmp.lt.u32.totalorder %s1945_s27, %s2377_s4 }
  0x38   :  { %p1951_p12 = pnand %p1949_p11, %p1946_p10 }
  0x3a   :  { %1954 = shalt.err (!%p1951_p12)
}
  0x3b   :  { %s1955_s10 = scalar_lea.vmem %s2066_s13, 256  ;;  %p1960_p0 = scmp.lt.s32.totalorder %s2066_s13, %s2066_s13 }
  0x3c   :  { %p1956_p13 = scmp.ne.s32.totalorder %s2066_s13, %s1955_s10  ;;  %p1961_p1 = scmp.lt.s32.totalorder %s1955_s10, %s1955_s10 }
  0x3e   :  { %p1962_p2 = por %p1961_p1, %p1960_p0 }
  0x40   :  { %p1963_p3 = pnand %p1962_p2, %p1956_p13 }
  0x42   :  { %1966 = shalt.err (!%p1963_p3)
}
  0x43   :  { %65 = dma.hbm_to_vmem [thread:$0]  %s2377_s4, 256, %s2066_s13, [#allocation9], %s1974_s15, %s1974_s15, %s1975_s16  }
  0x44   :  { %1967 = dma.done.wait [#allocation4], 256  }
  0x45   :  { %1968 = vsyncadd [#allocation4], 4294967040 }
  0x46   :  { %1969 = dma.done.wait [#allocation6], 256  }
  0x47   :  { %1970 = vsyncadd [#allocation6], 4294967040 }
  0x48   :  { %1971 = dma.done.wait [#allocation9], 256  }
  0x49   :  { %1972 = vsyncadd [#allocation9], 4294967040  ;;  %v1981_v0 = vmov 0.0   ;;  %vm1982_vm0 = vmmov 0   ;;  %v1983_v1 = vmov 36   ;;  %v1778_v2 = vld [vmem:[#allocation7] sm:$0xff]   ;;  %v194_v17 = vlaneseq }
  0x4a   :  { %1640 = vmatprep.subr.bf16.mxu0 %v1981_v0  ;;  %1642 = vmatprep.mubr.msk.bf16.mxu0 %vm1982_vm0, %v1981_v0  ;;  %v89_v3 = vld [vmem:[#allocation3] sm:$0xff]  ;;  %v90_v4 = vld [vmem:[#allocation3 + $0x8] sm:$0xff]  ;;  %vm100_vm1 = vcmask 130048   ;;  %v1984_v6 = vmov 37   ;;  %s1985_s4 = smov 96   ;;  %v1986_v12 = vmov 38  }
  0x4b   :  { %1754 = vset.pattern.permute.xlu1 %v1983_v1  ;;  %1646 = vmatprep.subr.bf16.mxu1 %v1981_v0  ;;  %v91_v5 = vpack.c.bf16 %v90_v4, %v89_v3  ;;  %v1987_v13 = vmov 39   ;;  %v195_v20 = vshrl.u32 %v194_v17, 7  ;;  %v1605_v24 = vld [vmem:[#allocation5] sm:$0xff]   ;;  %s1988_s15 = smov 120   ;;  %s1989_s16 = smov 104   ;;  %vm544_vm2 = vcmask 64512  }
  0x4c   :  { %1648 = vmatprep.mubr.msk.bf16.mxu1 %vm1982_vm0, %v1981_v0  ;;  %1641 = vmatpush3.bf16.msra.mxu0 %v1778_v2  ;;  %v2132_v27 = vunpack.c.h.bf16 %v1605_v24  ;;  %v2134_v28 = vunpack.c.l.bf16 %v1605_v24  ;;  %s1990_s12 = smov 112   ;;  %s1991_s13 = smov 16   ;;  %vm555_vm3 = vcmask 130112   ;;  %vm566_vm4 = vcmask 195712  }
  0x4d   :  { %1652 = vmatprep.subr.bf16.mxu0 %v1981_v0  ;;  %1755 = vset.pattern.permute.xlu0 %v1984_v6  ;;  %v2129_v23 = vsub.s32 0, %v195_v20  ;;  %v2144_v40 = vsub.s32 1, %v195_v20  ;;  %v2147_v42 = vsub.s32 2, %v195_v20  ;;  %v2151_v48 = vsub.s32 3, %v195_v20  ;;  %s1992_s14 = smov 24  }
  0x4e   :  { %vm577_vm5 = vcmask 261312   ;;  %vm608_vm6 = vcmask 261120  }
  0x4f   :  { %1643 = vmatmul.mubr.msk.bf16.vlgmr.msra.gmra.mrb[0].mxu0 %vm100_vm1, %v91_v5 }
  0x50   :  { %1654 = vmatprep.mubr.msk.bf16.mxu0 %vm1982_vm0, %v1981_v0 }
 0x122   :  { %v138_v7 = vpop.f32.mrb[0].mxu0 }
 0x123   :  { %187 = vperm.xlu1 %1754, %v138_v7   ;;  %148 = vrot.lane.b32.xlu0 %v138_v7, %s1985_s4  ;;  %v1644_v8 = vpop.f32.mrb[1].mxu0 }
 0x124   :  { %v141_v9 = vpop.f32.mrb[2].mxu0 }
 0x125   :  { %v1645_v10 = vpop.f32.mrb[3].mxu0  ;;  %v2116_v11 = vpack.c.bf16 %v141_v9, %v138_v7 }
 0x127   :  { %1756 = vset.pattern.permute.xlu1 %v1986_v12  ;;  %150 = vrot.lane.b32.xlu0 %v141_v9, %s1985_s4 }
 0x128   :  { %1647 = vmatpush3.bf16.msra.mxu1 %v2116_v11  ;;  %365 = vperm.xlu1 %1756, %v138_v7  }
 0x129   :  { %1658 = vmatprep.subr.bf16.mxu1 %v1981_v0 }
 0x12b   :  { %274 = vperm.xlu0 %1755, %v138_v7  }
 0x12c   :  { %1757 = vset.pattern.permute.xlu1 %v1987_v13 }
 0x12d   :  { %455 = vperm.xlu1 %1757, %v138_v7  }
 0x12f   :  { %1760 = vset.pattern.permute.xlu0 %v1986_v12 }
 0x130   :  { %369 = vperm.xlu0 %1760, %v141_v9  }
 0x131   :  { %1758 = vset.pattern.permute.xlu1 %v1983_v1 }
 0x132   :  { %191 = vperm.xlu1 %1758, %v141_v9  }
 0x136   :  { %1759 = vset.pattern.permute.xlu1 %v1984_v6 }
 0x137   :  { %278 = vperm.xlu1 %1759, %v141_v9  }
 0x13b   :  { %1761 = vset.pattern.permute.xlu1 %v1987_v13 }
 0x13c   :  { %459 = vperm.xlu1 %1761, %v141_v9  }
 0x140   :  { %1762 = vset.pattern.permute.xlu1 %v1983_v1 }
 0x195   :  { %v149_v14 = vpop.permute.xlu0 %148 }
 0x196   :  { %154 = vxpose.xlu0.b32.start [1/2] (short) (narrow) %v149_v14, 8 }
 0x199   :  { %v151_v15 = vpop.permute.xlu0 %150 }
 0x19a   :  { %155 = vxpose.xlu0.b32.end [2/2] (short) (narrow) %v151_v15, 8 }
 0x1a2   :  { %v188_v16 = vpop.permute.xlu1 %187 }
 0x1a7   :  { %v366_v18 = vpop.permute.xlu1 %365 }
 0x1aa   :  { %v275_v19 = vpop.permute.xlu0 %274 }
 0x1ac   :  { %v456_v21 = vpop.permute.xlu1 %455 }
 0x1af   :  { %v370_v22 = vpop.permute.xlu0 %369 }
 0x1b1   :  { %v192_v29 = vpop.permute.xlu1 %191 }
 0x1b6   :  { %v279_v44 = vpop.permute.xlu1 %278 }
 0x1bb   :  { %v460_v62 = vpop.permute.xlu1 %459 }
 0x1c3   :  { %1764 = vset.pattern.permute.xlu0 %v1983_v1 }
 0x216   :  { %v170_v25 = vpop.trf.xlu0 }
 0x217   :  { %v197_v26 = vrot.slane %v170_v25, %v2129_v23  ;;  %v284_v41 = vrot.slane %v170_v25, %v2144_v40  ;;  %v375_v45 = vrot.slane %v170_v25, %v2147_v42  ;;  %v465_v52 = vrot.slane %v170_v25, %v2151_v48 }
 0x219   :  { %v199_v30 = vadd.f32 %v197_v26, %v192_v29  ;;  %v198_v31 = vadd.f32 %v197_v26, %v188_v16  ;;  %v285_v43 = vadd.f32 %v284_v41, %v275_v19  ;;  %v286_v47 = vadd.f32 %v284_v41, %v279_v44 }
 0x21a   :  { %v376_v51 = vadd.f32 %v375_v45, %v366_v18  ;;  %v377_v56 = vadd.f32 %v375_v45, %v370_v22  ;;  %v466_v57 = vadd.f32 %v465_v52, %v456_v21  ;;  %v467_v63 = vadd.f32 %v465_v52, %v460_v62 }
 0x21b   :  { %v201_v32 = vadd.f32 %v2132_v27, %v199_v30  ;;  %v200_v33 = vadd.f32 %v2134_v28, %v198_v31  ;;  %v287_v46 = vadd.f32 %v2134_v28, %v285_v43  ;;  %v288_v50 = vadd.f32 %v2132_v27, %v286_v47 }
 0x21c   :  { %v378_v55 = vadd.f32 %v2134_v28, %v376_v51  ;;  %v379_v61 = vadd.f32 %v2132_v27, %v377_v56  ;;  %v468_v5 = vadd.f32 %v2134_v28, %v466_v57  ;;  %v469_v10 = vadd.f32 %v2132_v27, %v467_v63 }
 0x21d   :  { %v203_v34 = vmul.f32 0.2, %v201_v32  ;;  %v202_v35 = vmul.f32 0.2, %v200_v33  ;;  %v289_v49 = vmul.f32 0.2, %v287_v46 }
 0x21e   :  { %v290_v54 = vmul.f32 0.2, %v288_v50  ;;  %v380_v60 = vmul.f32 0.2, %v378_v55  ;;  %v381_v4 = vmul.f32 0.2, %v379_v61 }
 0x21f   :  { %v205_v36 = vmax.f32 %v201_v32, %v203_v34  ;;  %v204_v37 = vmax.f32 %v200_v33, %v202_v35  ;;  %v291_v53 = vmax.f32 %v287_v46, %v289_v49  ;;  %v470_v9 = vmul.f32 0.2, %v468_v5 }
 0x220   :  { %v292_v59 = vmax.f32 %v288_v50, %v290_v54  ;;  %v382_v3 = vmax.f32 %v378_v55, %v380_v60  ;;  %v383_v8 = vmax.f32 %v379_v61, %v381_v4  ;;  %v471_v16 = vmul.f32 0.2, %v469_v10 }
 0x221   :  { %v209_v38 = vsel %vm100_vm1, %v205_v36, -inf  ;;  %v206_v39 = vsel %vm100_vm1, %v204_v37, -inf  ;;  %v293_v58 = vsel %vm100_vm1, %v291_v53, -inf  ;;  %v472_v15 = vmax.f32 %v468_v5, %v470_v9 }
 0x222   :  { %210 = vmax.xlane.f32.xlu0 %v209_v38  ;;  %207 = vmax.xlane.f32.xlu1 %v206_v39  ;;  %v296_v2 = vsel %vm100_vm1, %v292_v59, -inf  ;;  %v384_v7 = vsel %vm100_vm1, %v382_v3, -inf  ;;  %v387_v14 = vsel %vm100_vm1, %v383_v8, -inf  ;;  %v473_v18 = vmax.f32 %v469_v10, %v471_v16 }
 0x223   :  { %v474_v17 = vsel %vm100_vm1, %v472_v15, -inf }
 0x224   :  { %v477_v19 = vsel %vm100_vm1, %v473_v18, -inf }
 0x233   :  { %315 = vrot.lane.b32.xlu1 %v2116_v11, %s1988_s15 }
 0x238   :  { %495 = vrot.lane.b32.xlu0 %v2116_v11, %s1989_s16 }
 0x257   :  { %294 = vmax.xlane.f32.xlu1 %v293_v58 }
 0x25b   :  { %297 = vmax.xlane.f32.xlu1 %v296_v2 }
 0x25f   :  { %385 = vmax.xlane.f32.xlu1 %v384_v7 }
 0x263   :  { %388 = vmax.xlane.f32.xlu1 %v387_v14 }
 0x267   :  { %475 = vmax.xlane.f32.xlu1 %v474_v17 }
 0x26b   :  { %478 = vmax.xlane.f32.xlu1 %v477_v19 }
 0x27c   :  { %405 = vrot.lane.b32.xlu1 %v2116_v11, %s1990_s12 }
 0x2af   :  { %v211_v20 = vpop.xlane.xlu0 %210  ;;  %v208_v21 = vpop.xlane.xlu1 %207 }
 0x2b0   :  { %v213_v22 = vsub.f32 %v205_v36, %v211_v20  ;;  %v212_v24 = vsub.f32 %v204_v37, %v208_v21 }
 0x2b2   :  { %v216_v25 = vmul.f32 1.442695, %v213_v22  ;;  %v214_v26 = vmul.f32 1.442695, %v212_v24 }
 0x2b3   :  { %v316_v29 = vpop.permute.xlu1 %315  ;;  %v496_v57 = vpop.permute.xlu0 %495 }
 0x2b4   :  { %1783 = vpow2.f32 %v216_v25  ;;  %1653 = vmatpush3.bf16.msra.mxu0 %v316_v29 }
 0x2b5   :  { %1785 = vpow2.f32 %v214_v26  ;;  %1664 = vmatprep.subr.bf16.mxu0 %v1981_v0 }
 0x2be   :  { %v2168_v30 = vpop.eup %1783 }
 0x2bf   :  { %v1786_v31 = vpop.eup %1785  ;;  %v221_v10 = vsel %vm100_vm1, %v2168_v30, 0.0 }
 0x2c0   :  { %v226_v32 = vpack.c.bf16 %v2168_v30, %v1786_v31  ;;  %v218_v61 = vsel %vm100_vm1, %v1786_v31, 0.0 }
 0x2c2   :  { %1649 = vmatmul.mubr.msk.bf16.vlgmr.msra.gmra.mrb[0].mxu1 %vm100_vm1, %v226_v32 }
 0x2c3   :  { %1660 = vmatprep.mubr.msk.bf16.mxu1 %vm1982_vm0, %v1981_v0 }
 0x2e4   :  { %v295_v11 = vpop.xlane.xlu1 %294 }
 0x2e5   :  { %v299_v33 = vsub.f32 %v291_v53, %v295_v11 }
 0x2e7   :  { %v301_v34 = vmul.f32 1.442695, %v299_v33 }
 0x2e8   :  { %v298_v35 = vpop.xlane.xlu1 %297 }
 0x2e9   :  { %1787 = vpow2.f32 %v301_v34  ;;  %v300_v36 = vsub.f32 %v292_v59, %v298_v35 }
 0x2eb   :  { %v303_v37 = vmul.f32 1.442695, %v300_v36 }
 0x2ec   :  { %v386_v38 = vpop.xlane.xlu1 %385 }
 0x2ed   :  { %1789 = vpow2.f32 %v303_v37  ;;  %v390_v39 = vsub.f32 %v382_v3, %v386_v38 }
 0x2ef   :  { %v392_v41 = vmul.f32 1.442695, %v390_v39 }
 0x2f0   :  { %v389_v43 = vpop.xlane.xlu1 %388 }
 0x2f1   :  { %1791 = vpow2.f32 %v392_v41  ;;  %v391_v44 = vsub.f32 %v383_v8, %v389_v43 }
 0x2f3   :  { %v1788_v45 = vpop.eup %1787  ;;  %v394_v46 = vmul.f32 1.442695, %v391_v44  ;;  %v1779_v44 = vld [vmem:[#allocation8] sm:$0xff]  }
 0x2f4   :  { %v476_v47 = vpop.xlane.xlu1 %475  ;;  %v305_v49 = vsel %vm100_vm1, %v1788_v45, 0.0 }
 0x2f5   :  { %1793 = vpow2.f32 %v394_v46  ;;  %v480_v50 = vsub.f32 %v472_v15, %v476_v47  ;;  %306 = vadd.xlane.f32.xlu1 %v305_v49 }
 0x2f7   :  { %v1790_v51 = vpop.eup %1789  ;;  %v482_v52 = vmul.f32 1.442695, %v480_v50  ;;  %v1780_v50 = vld [vmem:[#allocation8 + $0x8] sm:$0xff]  }
 0x2f8   :  { %v479_v53 = vpop.xlane.xlu1 %478  ;;  %v308_v54 = vsel %vm100_vm1, %v1790_v51, 0.0  ;;  %v313_v55 = vpack.c.bf16 %v1790_v51, %v1788_v45 }
 0x2f9   :  { %1795 = vpow2.f32 %v482_v52  ;;  %v481_v56 = vsub.f32 %v473_v18, %v479_v53  ;;  %309 = vadd.xlane.f32.xlu0 %v308_v54 }
 0x2fa   :  { %1655 = vmatmul.mubr.msk.bf16.vlgmr.msra.gmra.mrb[4].mxu0 %vm100_vm1, %v313_v55 }
 0x2fb   :  { %v1792_v58 = vpop.eup %1791  ;;  %v484_v59 = vmul.f32 1.442695, %v481_v56  ;;  %1665 = vmatpush3.bf16.msra.mxu0 %v496_v57  ;;  %1666 = vmatprep.mubr.msk.bf16.mxu0 %vm1982_vm0, %v1981_v0 }
 0x2fc   :  { %v406_v60 = vpop.permute.xlu1 %405  ;;  %v396_v62 = vsel %vm100_vm1, %v1792_v58, 0.0  ;;  %1678 = vmatprep.subr.bf16.mxu0 %v1981_v0 }
 0x2fd   :  { %1797 = vpow2.f32 %v484_v59  ;;  %219 = vadd.xlane.f32.xlu0 %v218_v61  ;;  %397 = vadd.xlane.f32.xlu1 %v396_v62 }
 0x2fe   :  { %1659 = vmatpush3.bf16.msra.mxu1 %v406_v60 }
 0x2ff   :  { %v1794_v63 = vpop.eup %1793  ;;  %1670 = vmatprep.subr.bf16.mxu1 %v1981_v0 }
 0x300   :  { %v399_v2 = vsel %vm100_vm1, %v1794_v63, 0.0  ;;  %v404_v3 = vpack.c.bf16 %v1794_v63, %v1792_v58 }
 0x301   :  { %400 = vadd.xlane.f32.xlu1 %v399_v2 }
 0x302   :  { %1661 = vmatmul.mubr.msk.bf16.vlgmr.msra.gmra.mrb[4].mxu1 %vm100_vm1, %v404_v3 }
 0x303   :  { %v1796_v4 = vpop.eup %1795  ;;  %1674 = vmatprep.mubr.msk.bf16.mxu1 %vm1982_vm0, %v1981_v0  ;;  %1671 = vmatpush3.bf16.msra.mxu1 %v1779_v44 }
 0x304   :  { %v486_v5 = vsel %vm100_vm1, %v1796_v4, 0.0  ;;  %1672 = vmatprep.subr.bf16.mxu1 %v1981_v0 }
 0x305   :  { %487 = vadd.xlane.f32.xlu1 %v486_v5 }
 0x307   :  { %v1798_v7 = vpop.eup %1797  ;;  %1673 = vmatpush3.bf16.msra.mxu1 %v1780_v50 }
 0x308   :  { %v489_v8 = vsel %vm100_vm1, %v1798_v7, 0.0  ;;  %v494_v9 = vpack.c.bf16 %v1798_v7, %v1796_v4  ;;  %1684 = vmatprep.subr.bf16.mxu1 %v1981_v0  ;;  %v1587_v7 = vld [vmem:[%s2376_s3] ss:$0 sm:$0xff] }
 0x309   :  { %490 = vadd.xlane.f32.xlu1 %v489_v8 }
 0x30a   :  { %1667 = vmatmul.mubr.msk.bf16.vlgmr.msra.gmra.mrb[8].mxu0 %vm100_vm1, %v494_v9 }
 0x30b   :  { %1680 = vmatprep.mubr.msk.bf16.mxu0 %vm1982_vm0, %v1981_v0 }
 0x30d   :  { %222 = vadd.xlane.f32.xlu1 %v221_v10 }
 0x382   :  { %v307_v14 = vpop.xlane.xlu1 %306 }
 0x386   :  { %v310_v15 = vpop.xlane.xlu0 %309 }
 0x38a   :  { %v220_v16 = vpop.xlane.xlu0 %219  ;;  %v398_v17 = vpop.xlane.xlu1 %397 }
 0x38b   :  { %1799 = vrcp.f32 %v220_v16 }
 0x38e   :  { %v401_v18 = vpop.xlane.xlu1 %400 }
 0x392   :  { %v488_v19 = vpop.xlane.xlu1 %487 }
 0x395   :  { %v1800_v20 = vpop.eup %1799  ;;  %v264_v21 = vpop.f32.mrb[0].mxu1 }
 0x396   :  { %v271_v22 = vmul.f32 %v1800_v20, %v264_v21  ;;  %v1650_v24 = vpop.f32.mrb[1].mxu1  ;;  %v491_v25 = vpop.xlane.xlu1 %490 }
 0x397   :  { %v267_v26 = vpop.f32.mrb[2].mxu1 }
 0x398   :  { %545 = vst.msk [vmem:[#allocation2] sm:$0xff] %vm544_vm2, %v271_v22  ;;  %v1651_v29 = vpop.f32.mrb[3].mxu1 }
 0x39a   :  { %v223_v31 = vpop.xlane.xlu1 %222 }
 0x39b   :  { %1801 = vrcp.f32 %v223_v31 }
 0x39c   :  { %1803 = vrcp.f32 %v307_v14 }
 0x39d   :  { %1805 = vrcp.f32 %v310_v15 }
 0x39e   :  { %1807 = vrcp.f32 %v398_v17 }
 0x39f   :  { %1809 = vrcp.f32 %v401_v18 }
 0x3a0   :  { %1811 = vrcp.f32 %v488_v19 }
 0x3a1   :  { %1813 = vrcp.f32 %v491_v25 }
 0x3a5   :  { %v1802_v30 = vpop.eup %1801 }
 0x3a6   :  { %v272_v32 = vmul.f32 %v1802_v30, %v267_v26  ;;  %v1804_v11 = vpop.eup %1803 }
 0x3a7   :  { %v1806_v36 = vpop.eup %1805 }
 0x3a8   :  { %546 = vst.msk [vmem:[#allocation2 + $0x8] sm:$0xff] %vm544_vm2, %v272_v32  ;;  %v1808_v41 = vpop.eup %1807 }
 0x3a9   :  { %v1810_v47 = vpop.eup %1809 }
 0x3aa   :  { %v1812_v53 = vpop.eup %1811 }
 0x3ab   :  { %v1814_v57 = vpop.eup %1813 }
 0x3cd   :  { %v355_v33 = vpop.f32.mrb[4].mxu0 }
 0x3ce   :  { %v362_v34 = vmul.f32 %v1804_v11, %v355_v33  ;;  %v1656_v35 = vpop.f32.mrb[5].mxu0 }
 0x3cf   :  { %v358_v37 = vpop.f32.mrb[6].mxu0 }
 0x3d0   :  { %v363_v38 = vmul.f32 %v1806_v36, %v358_v37  ;;  %v1657_v39 = vpop.f32.mrb[7].mxu0  ;;  %549 = vrot.lane.b32.xlu0 %v362_v34, %s1978_s28 }
 0x3d2   :  { %551 = vrot.lane.b32.xlu1 %v363_v38, %s1978_s28 }
 0x3d5   :  { %v445_v43 = vpop.f32.mrb[4].mxu1 }
 0x3d6   :  { %v452_v45 = vmul.f32 %v1808_v41, %v445_v43  ;;  %v1662_v46 = vpop.f32.mrb[5].mxu1 }
 0x3d7   :  { %v448_v49 = vpop.f32.mrb[6].mxu1 }
 0x3d8   :  { %v453_v51 = vmul.f32 %v1810_v47, %v448_v49  ;;  %v1663_v52 = vpop.f32.mrb[7].mxu1  ;;  %560 = vrot.lane.b32.xlu1 %v452_v45, %s1991_s13 }
 0x3da   :  { %562 = vrot.lane.b32.xlu0 %v453_v51, %s1991_s13 }
 0x3dd   :  { %v535_v54 = vpop.f32.mrb[8].mxu0 }
 0x3de   :  { %v542_v55 = vmul.f32 %v1812_v53, %v535_v54  ;;  %v1668_v56 = vpop.f32.mrb[9].mxu0 }
 0x3df   :  { %v538_v58 = vpop.f32.mrb[10].mxu0 }
 0x3e0   :  { %v543_v59 = vmul.f32 %v1814_v57, %v538_v58  ;;  %v1669_v60 = vpop.f32.mrb[11].mxu0  ;;  %571 = vrot.lane.b32.xlu1 %v542_v55, %s1992_s14 }
 0x3e2   :  { %573 = vrot.lane.b32.xlu0 %v543_v59, %s1992_s14 }
 0x442   :  { %v550_v61 = vpop.permute.xlu0 %549 }
 0x443   :  { %556 = vst.msk [vmem:[#allocation2] sm:$0xff] %vm555_vm3, %v550_v61 }
 0x444   :  { %v552_v62 = vpop.permute.xlu1 %551 }
 0x445   :  { %557 = vst.msk [vmem:[#allocation2 + $0x8] sm:$0xff] %vm555_vm3, %v552_v62 }
 0x44a   :  { %v561_v63 = vpop.permute.xlu1 %560 }
 0x44b   :  { %567 = vst.msk [vmem:[#allocation2] sm:$0xff] %vm566_vm4, %v561_v63 }
 0x44c   :  { %v563_v2 = vpop.permute.xlu0 %562 }
 0x44d   :  { %568 = vst.msk [vmem:[#allocation2 + $0x8] sm:$0xff] %vm566_vm4, %v563_v2 }
 0x452   :  { %v572_v3 = vpop.permute.xlu1 %571 }
 0x453   :  { %578 = vst.msk [vmem:[#allocation2] sm:$0xff] %vm577_vm5, %v572_v3 }
 0x454   :  { %v574_v4 = vpop.permute.xlu0 %573 }
 0x455   :  { %579 = vst.msk [vmem:[#allocation2 + $0x8] sm:$0xff] %vm577_vm5, %v574_v4 }
 0x45a   :  { %v580_v5 = vld [vmem:[#allocation2] sm:$0xff] }
 0x45b   :  { %v589_v9 = vadd.f32 %v1587_v7, %v580_v5 }
 0x45c   :  { %v581_v8 = vld [vmem:[#allocation2 + $0x8] sm:$0xff] }
 0x45d   :  { %v590_v10 = vadd.f32 %v1587_v7, %v581_v8 }
 0x45f   :  { %v591_v14 = vpack.c.bf16 %v590_v10, %v589_v9 }
 0x461   :  { %1675 = vmatmul.mubr.msk.bf16.vlgmr.msra.gmra.mrb[8].mxu1 %vm608_vm6, %v591_v14 }
 0x462   :  { %1686 = vmatprep.mubr.msk.bf16.mxu1 %vm1982_vm0, %v1981_v0 }
 0x534   :  { %v646_v15 = vpop.f32.mrb[8].mxu1 }
 0x535   :  { %656 = vrot.lane.b32.xlu1 %v646_v15, %s1985_s4  ;;  %v1676_v16 = vpop.f32.mrb[9].mxu1 }
 0x536   :  { %v649_v17 = vpop.f32.mrb[10].mxu1 }
 0x537   :  { %658 = vrot.lane.b32.xlu0 %v649_v17, %s1985_s4  ;;  %v1677_v18 = vpop.f32.mrb[11].mxu1  ;;  %v2218_v19 = vpack.c.bf16 %v649_v17, %v646_v15 }
 0x539   :  { %695 = vperm.xlu1 %1762, %v646_v15   ;;  %1679 = vmatpush3.bf16.msra.mxu0 %v2218_v19 }
 0x53a   :  { %1690 = vmatprep.subr.bf16.mxu0 %v1981_v0 }
 0x53b   :  { %699 = vperm.xlu0 %1764, %v649_v17  }
 0x53d   :  { %1763 = vset.pattern.permute.xlu1 %v1984_v6 }
 0x53e   :  { %782 = vperm.xlu1 %1763, %v646_v15  }
 0x53f   :  { %1765 = vset.pattern.permute.xlu0 %v1986_v12 }
 0x540   :  { %873 = vperm.xlu0 %1765, %v646_v15  }
 0x542   :  { %1766 = vset.pattern.permute.xlu1 %v1987_v13 }
 0x543   :  { %963 = vperm.xlu1 %1766, %v646_v15  }
 0x544   :  { %1769 = vset.pattern.permute.xlu0 %v1987_v13 }
 0x545   :  { %967 = vperm.xlu0 %1769, %v649_v17  }
 0x547   :  { %1767 = vset.pattern.permute.xlu1 %v1984_v6 }
 0x548   :  { %786 = vperm.xlu1 %1767, %v649_v17  }
 0x549   :  { %823 = vrot.lane.b32.xlu0 %v2218_v19, %s1988_s15 }
 0x54a   :  { %1772 = vset.pattern.permute.xlu0 %v1983_v1 }
 0x54c   :  { %1768 = vset.pattern.permute.xlu1 %v1986_v12 }
 0x54d   :  { %877 = vperm.xlu1 %1768, %v649_v17  }
 0x5a7   :  { %v657_v20 = vpop.permute.xlu1 %656 }
 0x5a8   :  { %662 = vxpose.xlu1.b32.start [1/2] (short) (narrow) %v657_v20, 8 }
 0x5a9   :  { %v659_v21 = vpop.permute.xlu0 %658 }
 0x5ac   :  { %663 = vxpose.xlu1.b32.end [2/2] (short) (narrow) %v659_v21, 8 }
 0x5b8   :  { %v696_v29 = vpop.permute.xlu1 %695 }
 0x5ba   :  { %v700_v22 = vpop.permute.xlu0 %699 }
 0x5bd   :  { %v783_v31 = vpop.permute.xlu1 %782 }
 0x5bf   :  { %v874_v24 = vpop.permute.xlu0 %873 }
 0x5c2   :  { %v964_v30 = vpop.permute.xlu1 %963 }
 0x5c4   :  { %v968_v25 = vpop.permute.xlu0 %967 }
 0x5c7   :  { %v787_v32 = vpop.permute.xlu1 %786 }
 0x5c8   :  { %v824_v26 = vpop.permute.xlu0 %823 }
 0x5c9   :  { %1685 = vmatpush3.bf16.msra.mxu1 %v824_v26 }
 0x5ca   :  { %1696 = vmatprep.subr.bf16.mxu1 %v1981_v0  ;;  %1770 = vset.pattern.permute.xlu1 %v1983_v1 }
 0x5cc   :  { %v878_v11 = vpop.permute.xlu1 %877 }
 0x628   :  { %v678_v33 = vpop.trf.xlu1 }
 0x629   :  { %v705_v34 = vrot.slane %v678_v33, %v2129_v23  ;;  %v792_v35 = vrot.slane %v678_v33, %v2144_v40  ;;  %v883_v36 = vrot.slane %v678_v33, %v2147_v42  ;;  %v973_v53 = vrot.slane %v678_v33, %v2151_v48 }
 0x62b   :  { %v794_v37 = vadd.f32 %v792_v35, %v787_v32  ;;  %v706_v38 = vadd.f32 %v705_v34, %v696_v29  ;;  %v707_v39 = vadd.f32 %v705_v34, %v700_v22  ;;  %v793_v41 = vadd.f32 %v792_v35, %v783_v31 }
 0x62c   :  { %v884_v45 = vadd.f32 %v883_v36, %v874_v24  ;;  %v885_v55 = vadd.f32 %v883_v36, %v878_v11  ;;  %v974_v60 = vadd.f32 %v973_v53, %v964_v30  ;;  %v975_v3 = vadd.f32 %v973_v53, %v968_v25 }
 0x62d   :  { %v796_v43 = vadd.f32 %v2132_v27, %v794_v37  ;;  %v708_v1 = vadd.f32 %v2134_v28, %v706_v38  ;;  %v709_v44 = vadd.f32 %v2132_v27, %v707_v39  ;;  %v795_v50 = vadd.f32 %v2134_v28, %v793_v41 }
 0x62e   :  { %v886_v54 = vadd.f32 %v2134_v28, %v884_v45  ;;  %v887_v2 = vadd.f32 %v2132_v27, %v885_v55  ;;  %v976_v8 = vadd.f32 %v2134_v28, %v974_v60  ;;  %v977_v15 = vadd.f32 %v2132_v27, %v975_v3 }
 0x62f   :  { %v798_v46 = vmul.f32 0.2, %v796_v43  ;;  %v710_v47 = vmul.f32 0.2, %v708_v1  ;;  %v711_v49 = vmul.f32 0.2, %v709_v44 }
 0x630   :  { %v797_v59 = vmul.f32 0.2, %v795_v50  ;;  %v888_v63 = vmul.f32 0.2, %v886_v54  ;;  %v889_v7 = vmul.f32 0.2, %v887_v2 }
 0x631   :  { %v800_v51 = vmax.f32 %v796_v43, %v798_v46  ;;  %v712_v52 = vmax.f32 %v708_v1, %v710_v47  ;;  %v713_v58 = vmax.f32 %v709_v44, %v711_v49  ;;  %v978_v14 = vmul.f32 0.2, %v976_v8 }
 0x632   :  { %v799_v62 = vmax.f32 %v795_v50, %v797_v59  ;;  %v890_v5 = vmax.f32 %v886_v54, %v888_v63  ;;  %v891_v10 = vmax.f32 %v887_v2, %v889_v7  ;;  %v979_v18 = vmul.f32 0.2, %v977_v15 }
 0x633   :  { %v804_v56 = vsel %vm100_vm1, %v800_v51, -inf  ;;  %v714_v57 = vsel %vm100_vm1, %v712_v52, -inf  ;;  %v717_v61 = vsel %vm100_vm1, %v713_v58, -inf  ;;  %v980_v17 = vmax.f32 %v976_v8, %v978_v14 }
 0x634   :  { %805 = vmax.xlane.f32.xlu1 %v804_v56  ;;  %715 = vmax.xlane.f32.xlu0 %v714_v57  ;;  %v801_v4 = vsel %vm100_vm1, %v799_v62, -inf  ;;  %v892_v9 = vsel %vm100_vm1, %v890_v5, -inf  ;;  %v895_v16 = vsel %vm100_vm1, %v891_v10, -inf  ;;  %v981_v21 = vmax.f32 %v977_v15, %v979_v18 }
 0x635   :  { %v982_v20 = vsel %vm100_vm1, %v980_v17, -inf }
 0x636   :  { %v985_v22 = vsel %vm100_vm1, %v981_v21, -inf }
 0x638   :  { %718 = vmax.xlane.f32.xlu0 %v717_v61 }
 0x63c   :  { %802 = vmax.xlane.f32.xlu0 %v801_v4 }
 0x640   :  { %893 = vmax.xlane.f32.xlu0 %v892_v9 }
 0x644   :  { %896 = vmax.xlane.f32.xlu0 %v895_v16 }
 0x645   :  { %913 = vrot.lane.b32.xlu1 %v2218_v19, %s1990_s12 }
 0x648   :  { %983 = vmax.xlane.f32.xlu0 %v982_v20 }
 0x64c   :  { %986 = vmax.xlane.f32.xlu0 %v985_v22 }
 0x662   :  { %1003 = vrot.lane.b32.xlu0 %v2218_v19, %s1989_s16 }
 0x6c1   :  { %v806_v24 = vpop.xlane.xlu1 %805  ;;  %v716_v25 = vpop.xlane.xlu0 %715 }
 0x6c2   :  { %v808_v26 = vsub.f32 %v800_v51, %v806_v24  ;;  %v720_v29 = vsub.f32 %v712_v52, %v716_v25 }
 0x6c4   :  { %v811_v31 = vmul.f32 1.442695, %v808_v26  ;;  %v722_v30 = vmul.f32 1.442695, %v720_v29 }
 0x6c5   :  { %v719_v32 = vpop.xlane.xlu0 %718  ;;  %v914_v52 = vpop.permute.xlu1 %913 }
 0x6c6   :  { %1815 = vpow2.f32 %v811_v31  ;;  %v721_v11 = vsub.f32 %v713_v58, %v719_v32 }
 0x6c7   :  { %1817 = vpow2.f32 %v722_v30 }
 0x6c8   :  { %v724_v33 = vmul.f32 1.442695, %v721_v11 }
 0x6c9   :  { %v803_v34 = vpop.xlane.xlu0 %802 }
 0x6ca   :  { %1819 = vpow2.f32 %v724_v33  ;;  %v807_v35 = vsub.f32 %v799_v62, %v803_v34 }
 0x6cc   :  { %v809_v36 = vmul.f32 1.442695, %v807_v35 }
 0x6cd   :  { %v894_v37 = vpop.xlane.xlu0 %893 }
 0x6ce   :  { %1821 = vpow2.f32 %v809_v36  ;;  %v898_v38 = vsub.f32 %v890_v5, %v894_v37 }
 0x6d0   :  { %v1816_v39 = vpop.eup %1815  ;;  %v900_v19 = vmul.f32 1.442695, %v898_v38 }
 0x6d1   :  { %v897_v41 = vpop.xlane.xlu0 %896  ;;  %v816_v43 = vsel %vm100_vm1, %v1816_v39, 0.0  ;;  %v1818_v44 = vpop.eup %1817 }
 0x6d2   :  { %1823 = vpow2.f32 %v900_v19  ;;  %v899_v1 = vsub.f32 %v891_v10, %v897_v41  ;;  %817 = vadd.xlane.f32.xlu1 %v816_v43  ;;  %v726_v10 = vsel %vm100_vm1, %v1818_v44, 0.0 }
 0x6d4   :  { %v1820_v45 = vpop.eup %1819  ;;  %v902_v46 = vmul.f32 1.442695, %v899_v1  ;;  %v1781_v1 = vld [vmem:[%s2379_s6] sm:$0xff]  }
 0x6d5   :  { %v984_v47 = vpop.xlane.xlu0 %983  ;;  %v729_v49 = vsel %vm100_vm1, %v1820_v45, 0.0  ;;  %v734_v50 = vpack.c.bf16 %v1820_v45, %v1818_v44 }
 0x6d6   :  { %1825 = vpow2.f32 %v902_v46  ;;  %v988_v51 = vsub.f32 %v980_v17, %v984_v47  ;;  %730 = vadd.xlane.f32.xlu1 %v729_v49  ;;  %v1782_v49 = vld [vmem:[%s2379_s6 + $0x8] sm:$0xff]  }
 0x6d7   :  { %1681 = vmatmul.mubr.msk.bf16.vlgmr.msra.gmra.mrb[12].mxu0 %vm100_vm1, %v734_v50 }
 0x6d8   :  { %v1822_v53 = vpop.eup %1821  ;;  %v990_v54 = vmul.f32 1.442695, %v988_v51  ;;  %1691 = vmatpush3.bf16.msra.mxu0 %v914_v52  ;;  %1692 = vmatprep.mubr.msk.bf16.mxu0 %vm1982_vm0, %v1981_v0 }
 0x6d9   :  { %v987_v55 = vpop.xlane.xlu0 %986  ;;  %v813_v56 = vsel %vm100_vm1, %v1822_v53, 0.0  ;;  %v821_v57 = vpack.c.bf16 %v1816_v39, %v1822_v53  ;;  %1702 = vmatprep.subr.bf16.mxu0 %v1981_v0 }
 0x6da   :  { %1827 = vpow2.f32 %v990_v54  ;;  %v989_v58 = vsub.f32 %v981_v21, %v987_v55  ;;  %814 = vadd.xlane.f32.xlu0 %v813_v56 }
 0x6db   :  { %1687 = vmatmul.mubr.msk.bf16.vlgmr.msra.gmra.mrb[12].mxu1 %vm100_vm1, %v821_v57 }
 0x6dc   :  { %v1824_v59 = vpop.eup %1823  ;;  %v992_v60 = vmul.f32 1.442695, %v989_v58  ;;  %1698 = vmatprep.mubr.msk.bf16.mxu1 %vm1982_vm0, %v1981_v0 }
 0x6dd   :  { %v1004_v61 = vpop.permute.xlu0 %1003  ;;  %v904_v62 = vsel %vm100_vm1, %v1824_v59, 0.0 }
 0x6de   :  { %1829 = vpow2.f32 %v992_v60  ;;  %905 = vadd.xlane.f32.xlu0 %v904_v62  ;;  %1697 = vmatpush3.bf16.msra.mxu1 %v1004_v61 }
 0x6df   :  { %1710 = vmatprep.subr.bf16.mxu1 %v1981_v0 }
 0x6e0   :  { %v1826_v63 = vpop.eup %1825 }
 0x6e1   :  { %v907_v2 = vsel %vm100_vm1, %v1826_v63, 0.0  ;;  %v912_v3 = vpack.c.bf16 %v1826_v63, %v1824_v59 }
 0x6e2   :  { %908 = vadd.xlane.f32.xlu0 %v907_v2 }
 0x6e3   :  { %1693 = vmatmul.mubr.msk.bf16.vlgmr.msra.gmra.mrb[16].mxu0 %vm100_vm1, %v912_v3 }
 0x6e4   :  { %v1828_v4 = vpop.eup %1827  ;;  %1706 = vmatprep.mubr.msk.bf16.mxu0 %vm1982_vm0, %v1981_v0  ;;  %1703 = vmatpush3.bf16.msra.mxu0 %v1781_v1 }
 0x6e5   :  { %v994_v5 = vsel %vm100_vm1, %v1828_v4, 0.0  ;;  %1704 = vmatprep.subr.bf16.mxu0 %v1981_v0 }
 0x6e6   :  { %995 = vadd.xlane.f32.xlu0 %v994_v5  ;;  %v1595_v5 = vld [vmem:[%s2378_s5] ss:$0 sm:$0xff] }
 0x6e8   :  { %v1830_v7 = vpop.eup %1829  ;;  %1705 = vmatpush3.bf16.msra.mxu0 %v1782_v49 }
 0x6e9   :  { %v997_v8 = vsel %vm100_vm1, %v1830_v7, 0.0  ;;  %v1002_v9 = vpack.c.bf16 %v1830_v7, %v1828_v4  ;;  %1716 = vmatprep.subr.bf16.mxu0 %v1981_v0 }
 0x6ea   :  { %998 = vadd.xlane.f32.xlu0 %v997_v8 }
 0x6eb   :  { %1699 = vmatmul.mubr.msk.bf16.vlgmr.msra.gmra.mrb[16].mxu1 %vm100_vm1, %v1002_v9 }
 0x6ec   :  { %1712 = vmatprep.mubr.msk.bf16.mxu1 %vm1982_vm0, %v1981_v0 }
 0x6ee   :  { %727 = vadd.xlane.f32.xlu0 %v726_v10 }
 0x75f   :  { %v818_v20 = vpop.xlane.xlu1 %817 }
 0x763   :  { %v731_v22 = vpop.xlane.xlu1 %730 }
 0x767   :  { %v815_v14 = vpop.xlane.xlu0 %814 }
 0x76b   :  { %v906_v15 = vpop.xlane.xlu0 %905 }
 0x76f   :  { %v909_v16 = vpop.xlane.xlu0 %908 }
 0x773   :  { %v996_v17 = vpop.xlane.xlu0 %995 }
 0x777   :  { %v999_v18 = vpop.xlane.xlu0 %998 }
 0x77b   :  { %v728_v21 = vpop.xlane.xlu0 %727 }
 0x77c   :  { %1831 = vrcp.f32 %v728_v21 }
 0x77d   :  { %1833 = vrcp.f32 %v731_v22 }
 0x77e   :  { %1835 = vrcp.f32 %v815_v14 }
 0x77f   :  { %1837 = vrcp.f32 %v818_v20 }
 0x780   :  { %1839 = vrcp.f32 %v906_v15 }
 0x781   :  { %1841 = vrcp.f32 %v909_v16 }
 0x782   :  { %1843 = vrcp.f32 %v996_v17 }
 0x783   :  { %1845 = vrcp.f32 %v999_v18 }
 0x786   :  { %v1832_v24 = vpop.eup %1831 }
 0x787   :  { %v1834_v31 = vpop.eup %1833 }
 0x788   :  { %v1836_v33 = vpop.eup %1835 }
 0x789   :  { %v1838_v37 = vpop.eup %1837 }
 0x78a   :  { %v1840_v41 = vpop.eup %1839 }
 0x78b   :  { %v1842_v46 = vpop.eup %1841 }
 0x78c   :  { %v1844_v52 = vpop.eup %1843 }
 0x78d   :  { %v1846_v56 = vpop.eup %1845 }
 0x7aa   :  { %v772_v25 = vpop.f32.mrb[12].mxu0 }
 0x7ab   :  { %v779_v26 = vmul.f32 %v1832_v24, %v772_v25  ;;  %v1682_v29 = vpop.f32.mrb[13].mxu0 }
 0x7ac   :  { %v775_v30 = vpop.f32.mrb[14].mxu0 }
 0x7ad   :  { %1052 = vst.msk [vmem:[#allocation2] sm:$0xff] %vm544_vm2, %v779_v26  ;;  %v780_v32 = vmul.f32 %v1834_v31, %v775_v30  ;;  %v1683_v11 = vpop.f32.mrb[15].mxu0 }
 0x7ae   :  { %v863_v34 = vpop.f32.mrb[12].mxu1 }
 0x7af   :  { %1053 = vst.msk [vmem:[#allocation2 + $0x8] sm:$0xff] %vm544_vm2, %v780_v32  ;;  %v870_v35 = vmul.f32 %v1836_v33, %v863_v34  ;;  %v1688_v36 = vpop.f32.mrb[13].mxu1 }
 0x7b0   :  { %v866_v38 = vpop.f32.mrb[14].mxu1 }
 0x7b1   :  { %v871_v39 = vmul.f32 %v1838_v37, %v866_v38  ;;  %1056 = vrot.lane.b32.xlu0 %v870_v35, %s1978_s28  ;;  %v1689_v19 = vpop.f32.mrb[15].mxu1 }
 0x7b3   :  { %1058 = vrot.lane.b32.xlu1 %v871_v39, %s1978_s28 }
 0x7b6   :  { %v953_v43 = vpop.f32.mrb[16].mxu0 }
 0x7b7   :  { %v960_v44 = vmul.f32 %v1840_v41, %v953_v43  ;;  %v1694_v45 = vpop.f32.mrb[17].mxu0 }
 0x7b8   :  { %v956_v47 = vpop.f32.mrb[18].mxu0 }
 0x7b9   :  { %v961_v50 = vmul.f32 %v1842_v46, %v956_v47  ;;  %v1695_v51 = vpop.f32.mrb[19].mxu0  ;;  %1066 = vrot.lane.b32.xlu1 %v960_v44, %s1991_s13 }
 0x7bb   :  { %1068 = vrot.lane.b32.xlu0 %v961_v50, %s1991_s13 }
 0x7be   :  { %v1043_v53 = vpop.f32.mrb[16].mxu1 }
 0x7bf   :  { %v1050_v54 = vmul.f32 %v1844_v52, %v1043_v53  ;;  %v1700_v55 = vpop.f32.mrb[17].mxu1 }
 0x7c0   :  { %v1046_v57 = vpop.f32.mrb[18].mxu1 }
 0x7c1   :  { %v1051_v58 = vmul.f32 %v1846_v56, %v1046_v57  ;;  %1076 = vrot.lane.b32.xlu1 %v1050_v54, %s1992_s14  ;;  %v1701_v59 = vpop.f32.mrb[19].mxu1 }
 0x7c3   :  { %1078 = vrot.lane.b32.xlu0 %v1051_v58, %s1992_s14 }
 0x823   :  { %v1057_v60 = vpop.permute.xlu0 %1056 }
 0x824   :  { %1062 = vst.msk [vmem:[#allocation2] sm:$0xff] %vm555_vm3, %v1057_v60 }
 0x825   :  { %v1059_v61 = vpop.permute.xlu1 %1058 }
 0x826   :  { %1063 = vst.msk [vmem:[#allocation2 + $0x8] sm:$0xff] %vm555_vm3, %v1059_v61 }
 0x82b   :  { %v1067_v62 = vpop.permute.xlu1 %1066 }
 0x82c   :  { %1072 = vst.msk [vmem:[#allocation2] sm:$0xff] %vm566_vm4, %v1067_v62 }
 0x82d   :  { %v1069_v63 = vpop.permute.xlu0 %1068 }
 0x82e   :  { %1073 = vst.msk [vmem:[#allocation2 + $0x8] sm:$0xff] %vm566_vm4, %v1069_v63 }
 0x833   :  { %v1077_v2 = vpop.permute.xlu1 %1076 }
 0x834   :  { %1082 = vst.msk [vmem:[#allocation2] sm:$0xff] %vm577_vm5, %v1077_v2 }
 0x835   :  { %v1079_v3 = vpop.permute.xlu0 %1078 }
 0x836   :  { %1083 = vst.msk [vmem:[#allocation2 + $0x8] sm:$0xff] %vm577_vm5, %v1079_v3 }
 0x83b   :  { %v1084_v4 = vld [vmem:[#allocation2] sm:$0xff] }
 0x83c   :  { %v1093_v8 = vadd.f32 %v1595_v5, %v1084_v4 }
 0x83d   :  { %v1085_v7 = vld [vmem:[#allocation2 + $0x8] sm:$0xff] }
 0x83e   :  { %v1094_v9 = vadd.f32 %v1595_v5, %v1085_v7 }
 0x840   :  { %v1095_v10 = vpack.c.bf16 %v1094_v9, %v1093_v8 }
 0x842   :  { %1707 = vmatmul.mubr.msk.bf16.vlgmr.msra.gmra.mrb[20].mxu0 %vm608_vm6, %v1095_v10 }
 0x843   :  { %1718 = vmatprep.mubr.msk.bf16.mxu0 %vm1982_vm0, %v1981_v0 }
 0x915   :  { %v1149_v14 = vpop.f32.mrb[20].mxu0 }
 0x916   :  { %1159 = vrot.lane.b32.xlu1 %v1149_v14, %s1985_s4  ;;  %v1708_v15 = vpop.f32.mrb[21].mxu0 }
 0x917   :  { %v1152_v16 = vpop.f32.mrb[22].mxu0 }
 0x918   :  { %1161 = vrot.lane.b32.xlu0 %v1152_v16, %s1985_s4  ;;  %v1709_v17 = vpop.f32.mrb[23].mxu0  ;;  %v2309_v18 = vpack.c.bf16 %v1152_v16, %v1149_v14 }
 0x91a   :  { %1198 = vperm.xlu1 %1770, %v1149_v14   ;;  %1711 = vmatpush3.bf16.msra.mxu1 %v2309_v18 }
 0x91b   :  { %1722 = vmatprep.subr.bf16.mxu1 %v1981_v0 }
 0x91c   :  { %1202 = vperm.xlu0 %1772, %v1152_v16  }
 0x91e   :  { %1771 = vset.pattern.permute.xlu1 %v1984_v6 }
 0x91f   :  { %1285 = vperm.xlu1 %1771, %v1149_v14  }
 0x920   :  { %1773 = vset.pattern.permute.xlu0 %v1986_v12 }
 0x921   :  { %1376 = vperm.xlu0 %1773, %v1149_v14  }
 0x923   :  { %1774 = vset.pattern.permute.xlu1 %v1987_v13 }
 0x924   :  { %1466 = vperm.xlu1 %1774, %v1149_v14  }
 0x925   :  { %1777 = vset.pattern.permute.xlu0 %v1987_v13 }
 0x926   :  { %1470 = vperm.xlu0 %1777, %v1152_v16  }
 0x928   :  { %1775 = vset.pattern.permute.xlu1 %v1984_v6 }
 0x929   :  { %1289 = vperm.xlu1 %1775, %v1152_v16  }
 0x92a   :  { %1326 = vrot.lane.b32.xlu0 %v2309_v18, %s1988_s15 }
 0x92d   :  { %1776 = vset.pattern.permute.xlu1 %v1986_v12 }
 0x92e   :  { %1380 = vperm.xlu1 %1776, %v1152_v16  }
 0x988   :  { %v1160_v20 = vpop.permute.xlu1 %1159 }
 0x989   :  { %1165 = vxpose.xlu1.b32.start [1/2] (short) (narrow) %v1160_v20, 8 }
 0x98a   :  { %v1162_v21 = vpop.permute.xlu0 %1161 }
 0x98d   :  { %1166 = vxpose.xlu1.b32.end [2/2] (short) (narrow) %v1162_v21, 8 }
 0x999   :  { %v1199_v13 = vpop.permute.xlu1 %1198 }
 0x99b   :  { %v1203_v22 = vpop.permute.xlu0 %1202 }
 0x99e   :  { %v1286_v6 = vpop.permute.xlu1 %1285 }
 0x9a0   :  { %v1377_v24 = vpop.permute.xlu0 %1376 }
 0x9a3   :  { %v1467_v29 = vpop.permute.xlu1 %1466 }
 0x9a5   :  { %v1471_v25 = vpop.permute.xlu0 %1470 }
 0x9a8   :  { %v1290_v31 = vpop.permute.xlu1 %1289 }
 0x9a9   :  { %v1327_v26 = vpop.permute.xlu0 %1326 }
 0x9aa   :  { %1717 = vmatpush3.bf16.msra.mxu0 %v1327_v26 }
 0x9ab   :  { %1728 = vmatprep.subr.bf16.mxu0 %v1981_v0 }
 0x9ad   :  { %v1381_v30 = vpop.permute.xlu1 %1380 }
 0xa09   :  { %v1181_v32 = vpop.trf.xlu1 }
 0xa0a   :  { %v1208_v12 = vrot.slane %v1181_v32, %v2129_v23  ;;  %v1295_v11 = vrot.slane %v1181_v32, %v2144_v40  ;;  %v1386_v33 = vrot.slane %v1181_v32, %v2147_v42  ;;  %v1476_v42 = vrot.slane %v1181_v32, %v2151_v48 }
 0xa0c   :  { %v1297_v34 = vadd.f32 %v1295_v11, %v1290_v31  ;;  %v1209_v35 = vadd.f32 %v1208_v12, %v1199_v13  ;;  %v1210_v36 = vadd.f32 %v1208_v12, %v1203_v22  ;;  %v1296_v37 = vadd.f32 %v1295_v11, %v1286_v6 }
 0xa0d   :  { %v1387_v41 = vadd.f32 %v1386_v33, %v1377_v24  ;;  %v1388_v47 = vadd.f32 %v1386_v33, %v1381_v30  ;;  %v1477_v53 = vadd.f32 %v1476_v42, %v1467_v29  ;;  %v1478_v48 = vadd.f32 %v1476_v42, %v1471_v25 }
 0xa0e   :  { %v1299_v38 = vadd.f32 %v2132_v27, %v1297_v34  ;;  %v1211_v39 = vadd.f32 %v2134_v28, %v1209_v35  ;;  %v1212_v19 = vadd.f32 %v2132_v27, %v1210_v36  ;;  %v1298_v23 = vadd.f32 %v2134_v28, %v1296_v37 }
 0xa0f   :  { %v1389_v46 = vadd.f32 %v2134_v28, %v1387_v41  ;;  %v1390_v57 = vadd.f32 %v2132_v27, %v1388_v47  ;;  %v1479_v61 = vadd.f32 %v2134_v28, %v1477_v53  ;;  %v1480_v3 = vadd.f32 %v2132_v27, %v1478_v48 }
 0xa10   :  { %v1301_v43 = vmul.f32 0.2, %v1299_v38  ;;  %v1213_v1 = vmul.f32 0.2, %v1211_v39  ;;  %v1214_v44 = vmul.f32 0.2, %v1212_v19 }
 0xa11   :  { %v1300_v52 = vmul.f32 0.2, %v1298_v23  ;;  %v1391_v56 = vmul.f32 0.2, %v1389_v46  ;;  %v1392_v60 = vmul.f32 0.2, %v1390_v57 }
 0xa12   :  { %v1303_v45 = vmax.f32 %v1299_v38, %v1301_v43  ;;  %v1215_v40 = vmax.f32 %v1211_v39, %v1213_v1  ;;  %v1216_v51 = vmax.f32 %v1212_v19, %v1214_v44  ;;  %v1481_v2 = vmul.f32 0.2, %v1479_v61 }
 0xa13   :  { %v1302_v55 = vmax.f32 %v1298_v23, %v1300_v52  ;;  %v1393_v59 = vmax.f32 %v1389_v46, %v1391_v56  ;;  %v1394_v63 = vmax.f32 %v1390_v57, %v1392_v60  ;;  %v1482_v7 = vmul.f32 0.2, %v1480_v3 }
 0xa14   :  { %v1307_v49 = vsel %vm100_vm1, %v1303_v45, -inf  ;;  %v1217_v50 = vsel %vm100_vm1, %v1215_v40, -inf  ;;  %v1220_v54 = vsel %vm100_vm1, %v1216_v51, -inf  ;;  %v1483_v5 = vmax.f32 %v1479_v61, %v1481_v2 }
 0xa15   :  { %1308 = vmax.xlane.f32.xlu1 %v1307_v49  ;;  %1218 = vmax.xlane.f32.xlu0 %v1217_v50  ;;  %v1304_v58 = vsel %vm100_vm1, %v1302_v55, -inf  ;;  %v1395_v62 = vsel %vm100_vm1, %v1393_v59, -inf  ;;  %v1398_v4 = vsel %vm100_vm1, %v1394_v63, -inf  ;;  %v1484_v9 = vmax.f32 %v1480_v3, %v1482_v7 }
 0xa16   :  { %v1485_v8 = vsel %vm100_vm1, %v1483_v5, -inf }
 0xa17   :  { %v1488_v28 = vsel %vm100_vm1, %v1484_v9, -inf }
 0xa19   :  { %1221 = vmax.xlane.f32.xlu0 %v1220_v54 }
 0xa1d   :  { %1305 = vmax.xlane.f32.xlu0 %v1304_v58 }
 0xa21   :  { %1396 = vmax.xlane.f32.xlu0 %v1395_v62 }
 0xa25   :  { %1399 = vmax.xlane.f32.xlu0 %v1398_v4 }
 0xa26   :  { %1416 = vrot.lane.b32.xlu1 %v2309_v18, %s1990_s12 }
 0xa29   :  { %1486 = vmax.xlane.f32.xlu0 %v1485_v8 }
 0xa2d   :  { %1489 = vmax.xlane.f32.xlu0 %v1488_v28 }
 0xa43   :  { %1506 = vrot.lane.b32.xlu0 %v2309_v18, %s1989_s16 }
 0xaa2   :  { %v1219_v27 = vpop.xlane.xlu0 %1218  ;;  %v1309_v10 = vpop.xlane.xlu1 %1308 }
 0xaa3   :  { %v1223_v14 = vsub.f32 %v1215_v40, %v1219_v27  ;;  %v1311_v16 = vsub.f32 %v1303_v45, %v1309_v10 }
 0xaa5   :  { %v1225_v15 = vmul.f32 1.442695, %v1223_v14  ;;  %v1314_v22 = vmul.f32 1.442695, %v1311_v16 }
 0xaa6   :  { %v1222_v17 = vpop.xlane.xlu0 %1221  ;;  %v1417_v38 = vpop.permute.xlu1 %1416 }
 0xaa7   :  { %v1224_v20 = vsub.f32 %v1216_v51, %v1222_v17  ;;  %1847 = vpow2.f32 %v1225_v15 }
 0xaa9   :  { %v1227_v21 = vmul.f32 1.442695, %v1224_v20 }
 0xaaa   :  { %v1306_v24 = vpop.xlane.xlu0 %1305 }
 0xaab   :  { %1849 = vpow2.f32 %v1227_v21  ;;  %v1310_v25 = vsub.f32 %v1302_v55, %v1306_v24 }
 0xaac   :  { %1851 = vpow2.f32 %v1314_v22 }
 0xaad   :  { %v1312_v26 = vmul.f32 1.442695, %v1310_v25 }
 0xaae   :  { %v1397_v13 = vpop.xlane.xlu0 %1396 }
 0xaaf   :  { %1853 = vpow2.f32 %v1312_v26  ;;  %v1401_v6 = vsub.f32 %v1393_v59, %v1397_v13 }
 0xab1   :  { %v1403_v29 = vmul.f32 1.442695, %v1401_v6  ;;  %v1848_v18 = vpop.eup %1847 }
 0xab2   :  { %v1400_v31 = vpop.xlane.xlu0 %1399  ;;  %v1229_v32 = vsel %vm100_vm1, %v1848_v18, 0.0 }
 0xab3   :  { %v1402_v30 = vsub.f32 %v1394_v63, %v1400_v31  ;;  %1230 = vadd.xlane.f32.xlu0 %v1229_v32  ;;  %1855 = vpow2.f32 %v1403_v29 }
 0xab5   :  { %v1850_v12 = vpop.eup %1849  ;;  %v1405_v11 = vmul.f32 1.442695, %v1402_v30 }
 0xab6   :  { %v1487_v33 = vpop.xlane.xlu0 %1486  ;;  %v1232_v34 = vsel %vm100_vm1, %v1850_v12, 0.0  ;;  %v1237_v35 = vpack.c.bf16 %v1850_v12, %v1848_v18  ;;  %v1852_v37 = vpop.eup %1851 }
 0xab7   :  { %1857 = vpow2.f32 %v1405_v11  ;;  %v1491_v36 = vsub.f32 %v1483_v5, %v1487_v33  ;;  %1233 = vadd.xlane.f32.xlu1 %v1232_v34  ;;  %v1319_v40 = vsel %vm100_vm1, %v1852_v37, 0.0 }
 0xab8   :  { %1713 = vmatmul.mubr.msk.bf16.vlgmr.msra.gmra.mrb[20].mxu1 %vm100_vm1, %v1237_v35 }
 0xab9   :  { %v1854_v39 = vpop.eup %1853  ;;  %v1493_v19 = vmul.f32 1.442695, %v1491_v36  ;;  %1723 = vmatpush3.bf16.msra.mxu1 %v1417_v38  ;;  %1724 = vmatprep.mubr.msk.bf16.mxu1 %vm1982_vm0, %v1981_v0 }
 0xaba   :  { %v1490_v41 = vpop.xlane.xlu0 %1489  ;;  %v1316_v43 = vsel %vm100_vm1, %v1854_v39, 0.0  ;;  %v1324_v1 = vpack.c.bf16 %v1852_v37, %v1854_v39  ;;  %v1603_v39 = vld [vmem:[%s2380_s7] ss:$0 sm:$0xff] }
 0xabb   :  { %v1492_v44 = vsub.f32 %v1484_v9, %v1490_v41  ;;  %1317 = vadd.xlane.f32.xlu0 %v1316_v43  ;;  %1859 = vpow2.f32 %v1493_v19 }
 0xabc   :  { %1719 = vmatmul.mubr.msk.bf16.vlgmr.msra.gmra.mrb[24].mxu0 %vm100_vm1, %v1324_v1 }
 0xabd   :  { %v1495_v23 = vmul.f32 1.442695, %v1492_v44  ;;  %1730 = vmatprep.mubr.msk.bf16.mxu0 %vm1982_vm0, %v1981_v0  ;;  %v1856_v42 = vpop.eup %1855 }
 0xabe   :  { %v1507_v45 = vpop.permute.xlu0 %1506  ;;  %v1407_v47 = vsel %vm100_vm1, %v1856_v42, 0.0 }
 0xabf   :  { %1861 = vpow2.f32 %v1495_v23  ;;  %1320 = vadd.xlane.f32.xlu0 %v1319_v40  ;;  %1729 = vmatpush3.bf16.msra.mxu0 %v1507_v45 }
 0xac1   :  { %v1858_v46 = vpop.eup %1857 }
 0xac2   :  { %v1415_v49 = vpack.c.bf16 %v1858_v46, %v1856_v42  ;;  %v1410_v50 = vsel %vm100_vm1, %v1858_v46, 0.0 }
 0xac3   :  { %1408 = vadd.xlane.f32.xlu0 %v1407_v47 }
 0xac4   :  { %1725 = vmatmul.mubr.msk.bf16.vlgmr.msra.gmra.mrb[24].mxu1 %vm100_vm1, %v1415_v49 }
 0xac5   :  { %v1860_v51 = vpop.eup %1859 }
 0xac6   :  { %v1497_v0 = vsel %vm100_vm1, %v1860_v51, 0.0 }
 0xac7   :  { %1411 = vadd.xlane.f32.xlu0 %v1410_v50 }
 0xac9   :  { %v1862_v52 = vpop.eup %1861 }
 0xaca   :  { %v1500_v53 = vsel %vm100_vm1, %v1862_v52, 0.0  ;;  %v1505_v54 = vpack.c.bf16 %v1862_v52, %v1860_v51 }
 0xacb   :  { %1498 = vadd.xlane.f32.xlu0 %v1497_v0  ;;  %1501 = vadd.xlane.f32.xlu1 %v1500_v53 }
 0xacc   :  { %1731 = vmatmul.mubr.msk.bf16.vlgmr.msra.gmra.mrb[28].mxu0 %vm100_vm1, %v1505_v54 }
 0xb40   :  { %v1231_v55 = vpop.xlane.xlu0 %1230 }
 0xb41   :  { %1863 = vrcp.f32 %v1231_v55 }
 0xb44   :  { %v1234_v48 = vpop.xlane.xlu1 %1233 }
 0xb48   :  { %v1318_v56 = vpop.xlane.xlu0 %1317 }
 0xb49   :  { %1865 = vrcp.f32 %v1318_v56 }
 0xb4a   :  { %1867 = vrcp.f32 %v1234_v48 }
 0xb4b   :  { %v1864_v63 = vpop.eup %1863 }
 0xb4c   :  { %v1321_v57 = vpop.xlane.xlu0 %1320 }
 0xb4d   :  { %1869 = vrcp.f32 %v1321_v57 }
 0xb50   :  { %v1409_v58 = vpop.xlane.xlu0 %1408 }
 0xb51   :  { %1871 = vrcp.f32 %v1409_v58 }
 0xb53   :  { %v1866_v3 = vpop.eup %1865 }
 0xb54   :  { %v1412_v60 = vpop.xlane.xlu0 %1411  ;;  %v1868_v5 = vpop.eup %1867 }
 0xb55   :  { %1873 = vrcp.f32 %v1412_v60 }
 0xb57   :  { %v1870_v28 = vpop.eup %1869 }
 0xb58   :  { %v1499_v10 = vpop.xlane.xlu0 %1498  ;;  %v1502_v20 = vpop.xlane.xlu1 %1501 }
 0xb59   :  { %1875 = vrcp.f32 %v1499_v10 }
 0xb5a   :  { %1877 = vrcp.f32 %v1502_v20 }
 0xb5b   :  { %v1872_v22 = vpop.eup %1871 }
 0xb5f   :  { %v1874_v13 = vpop.eup %1873 }
 0xb63   :  { %v1876_v32 = vpop.eup %1875 }
 0xb64   :  { %v1878_v34 = vpop.eup %1877 }
 0xb8b   :  { %v1275_v59 = vpop.f32.mrb[20].mxu1 }
 0xb8c   :  { %v1714_v61 = vpop.f32.mrb[21].mxu1  ;;  %v1282_v7 = vmul.f32 %v1864_v63, %v1275_v59 }
 0xb8d   :  { %v1278_v62 = vpop.f32.mrb[22].mxu1 }
 0xb8e   :  { %v1715_v2 = vpop.f32.mrb[23].mxu1  ;;  %v1283_v14 = vmul.f32 %v1868_v5, %v1278_v62 }
 0xb8f   :  { %v1366_v4 = vpop.f32.mrb[24].mxu0 }
 0xb90   :  { %v1373_v8 = vmul.f32 %v1866_v3, %v1366_v4  ;;  %v1720_v9 = vpop.f32.mrb[25].mxu0 }
 0xb91   :  { %v1369_v27 = vpop.f32.mrb[26].mxu0 }
 0xb92   :  { %v1555_v15 = vadd.f32 %v1373_v8, %v1282_v7  ;;  %v1374_v16 = vmul.f32 %v1870_v28, %v1369_v27  ;;  %v1721_v17 = vpop.f32.mrb[27].mxu0 }
 0xb94   :  { %v1556_v21 = vadd.f32 %v1374_v16, %v1283_v14 }
 0xb97   :  { %v1456_v24 = vpop.f32.mrb[24].mxu1 }
 0xb98   :  { %v1463_v25 = vmul.f32 %v1872_v22, %v1456_v24  ;;  %v1726_v26 = vpop.f32.mrb[25].mxu1 }
 0xb99   :  { %v1459_v6 = vpop.f32.mrb[26].mxu1 }
 0xb9a   :  { %v1557_v29 = vadd.f32 %v1555_v15, %v1463_v25  ;;  %v1464_v18 = vmul.f32 %v1874_v13, %v1459_v6  ;;  %v1727_v31 = vpop.f32.mrb[27].mxu1 }
 0xb9c   :  { %v1558_v30 = vadd.f32 %v1556_v21, %v1464_v18 }
 0xb9f   :  { %v1546_v12 = vpop.f32.mrb[28].mxu0 }
 0xba0   :  { %v1553_v11 = vmul.f32 %v1876_v32, %v1546_v12  ;;  %v1732_v33 = vpop.f32.mrb[29].mxu0 }
 0xba1   :  { %v1549_v35 = vpop.f32.mrb[30].mxu0 }
 0xba2   :  { %v1559_v36 = vadd.f32 %v1557_v29, %v1553_v11  ;;  %v1554_v37 = vmul.f32 %v1878_v34, %v1549_v35  ;;  %v1733_v38 = vpop.f32.mrb[31].mxu0 }
 0xba4   :  { %v1561_v19 = vmul.f32 0.25, %v1559_v36  ;;  %v1560_v41 = vadd.f32 %v1558_v30, %v1554_v37 }
 0xba6   :  { %v1570_v43 = vadd.f32 %v1603_v39, %v1561_v19  ;;  %v1562_v1 = vmul.f32 0.25, %v1560_v41 }
 0xba8   :  { %1572 = vst.msk [vmem:[%s2381_s8] sm:$0xff] %vm544_vm2, %v1570_v43  ;;  %v1571_v44 = vadd.f32 %v1603_v39, %v1562_v1 }
 0xbaa   :  { %1573 = vst.msk [vmem:[%s2381_s8 + $0x8] sm:$0xff] %vm544_vm2, %v1571_v44 }
 0xbab   :  { %1578 = vsyncpa [#allocation4], 1 }
 0xbac   :  { %1579 = vsyncpa [#allocation6], 1 }
 0xbad   :  { %1580 = vsyncpa [#allocation9], 1 }

</bundles_post_ra>
